<compile_context>
chip_gen: v7x
topology: tpu7x:2x2x1
jax: 0.10.0
libtpu: 0.0.40
codegen_flags: <defaults>
</compile_context>

<pallas_src>
import functools
import math

import jax
import jax.numpy as jnp
from jax.experimental import pallas as pl
from jax.experimental.pallas import tpu as pltpu

EPS = 1e-6
N_HEADS = 4


# ----------------------------- in-kernel helpers -----------------------------
def _layer_norm(x, a2, b2, approx):
    # Matches the PyTorch module: a2 * (x - mean) / (std + eps) + b2, with
    # torch.std's unbiased (N-1) estimator and eps added to STD (not var).
    d = x.shape[-1]
    mean = jnp.mean(x, axis=-1, keepdims=True)
    var = jnp.sum((x - mean) ** 2, axis=-1, keepdims=True) / (d - 1)
    inv = pl.reciprocal(jnp.sqrt(var) + EPS, approx=approx)
    return a2 * (x - mean) * inv + b2


def _attend(q2d, k2d, v2d, mask, wo, bo, qh_s, kh_s, vh_s, ctx_s,
            n_heads, approx):
    """Multi-head attention core on already-projected Q/K/V.

    q2d: (T, D) f32, k2d/v2d: (S, D) f32, mask: (T, S) f32 0/1.
    wo: (D, D) compute dtype, bo: (1, D) f32.
    Heads move lanes -> leading axis through small VMEM scratch buffers so the
    score / PV contractions run as head-batched MXU matmuls; the output
    projection is a single full-K (=H*dk=D) matmul (== concat(heads) @ Wo).
    """
    d_k = q2d.shape[-1] // n_heads
    scale = 1.0 / math.sqrt(d_k)
    cdt = qh_s.dtype

    qc, kc, vc = q2d.astype(cdt), k2d.astype(cdt), v2d.astype(cdt)
    for h in range(n_heads):                       # static unroll over heads
        sl = slice(h * d_k, (h + 1) * d_k)
        qh_s[h] = qc[:, sl]
        kh_s[h] = kc[:, sl]
        vh_s[h] = vc[:, sl]

    # Head-batched scores: contract the last dims of Q and K (no transpose).
    scores = jnp.einsum("htk,hsk->hts", qh_s[...], kh_s[...],
                        preferred_element_type=jnp.float32) * scale
    # Mask / max / exp / sum all stay in f32.
    scores = jnp.where(mask[None, :, :] == 0.0, -1e9, scores)
    scores = scores - jnp.max(scores, axis=-1, keepdims=True)
    p = jnp.exp(scores)
    p = p * pl.reciprocal(jnp.sum(p, axis=-1, keepdims=True), approx=approx)

    ctx = jnp.einsum("hts,hsk->htk", p.astype(cdt), vh_s[...],
                     preferred_element_type=jnp.float32)        # (H, T, dk)
    for h in range(n_heads):                       # head axis -> lanes
        ctx_s[:, h * d_k:(h + 1) * d_k] = ctx[h].astype(cdt)
    return jnp.dot(ctx_s[...], wo, preferred_element_type=jnp.float32) + bo


# --------------------------------- kernel ------------------------------------
def _decoder_layer_kernel(
        x_ref, mem_ref, tgt_mask_ref, src_mask_ref,
        sa_wqkv, sa_bqkv, sa_wo, sa_bo,
        ca_wq, ca_bq, ca_wkv, ca_bkv, ca_wo, ca_bo,
        w1_ref, b1_ref, w2_ref, b2_ref,
        ln0_a, ln0_b, ln1_a, ln1_b, ln2_a, ln2_b,
        out_ref,
        qh_s, ks_s, vs_s, kc_s, vc_s, ctx_s,
        *, n_heads):
    cdt = qh_s.dtype                               # MXU operand dtype
    approx = jnp.dtype(cdt) != jnp.dtype(jnp.float32)
    x = x_ref[0]                                   # (T, D) residual stream, f32
    mem = mem_ref[0]                               # (S, D)
    d = x.shape[-1]

    # Sublayer 0: x = x + self_attn(norm(x), norm(x), norm(x), tgt_mask)
    xn = _layer_norm(x, ln0_a[...], ln0_b[...], approx)
    qkv = jnp.dot(xn.astype(cdt), sa_wqkv[...],
                  preferred_element_type=jnp.float32) + sa_bqkv[...]   # (T, 3D)
    x = x + _attend(qkv[:, :d], qkv[:, d:2 * d], qkv[:, 2 * d:],
                    tgt_mask_ref[0], sa_wo[...], sa_bo[...],
                    qh_s, ks_s, vs_s, ctx_s, n_heads, approx)

    # Sublayer 1: x = x + src_attn(norm(x), memory, memory, src_mask)
    xn = _layer_norm(x, ln1_a[...], ln1_b[...], approx)
    q = jnp.dot(xn.astype(cdt), ca_wq[...],
                preferred_element_type=jnp.float32) + ca_bq[...]       # (T, D)
    kv = jnp.dot(mem.astype(cdt), ca_wkv[...],
                 preferred_element_type=jnp.float32) + ca_bkv[...]     # (S, 2D)
    x = x + _attend(q, kv[:, :d], kv[:, d:],
                    src_mask_ref[0], ca_wo[...], ca_bo[...],
                    qh_s, kc_s, vc_s, ctx_s, n_heads, approx)

    # Sublayer 2: x = x + feed_forward(norm(x))
    xn = _layer_norm(x, ln2_a[...], ln2_b[...], approx)
    h = jnp.maximum(
        jnp.dot(xn.astype(cdt), w1_ref[...],
                preferred_element_type=jnp.float32) + b1_ref[...], 0.0)
    x = x + jnp.dot(h.astype(cdt), w2_ref[...],
                    preferred_element_type=jnp.float32) + b2_ref[...]

    out_ref[0] = x.astype(out_ref.dtype)           # dropout == identity (eval)


# -------------------------------- wrapper -------------------------------------
def _full_spec(shape):
    nd = len(shape)
    return pl.BlockSpec(shape, lambda b, _nd=nd: (0,) * _nd)


def decoder_layer(x, memory, src_mask, tgt_mask, params, n_heads=N_HEADS,
                  compute_dtype=jnp.bfloat16):
    B, T, D = x.shape
    S = memory.shape[1]
    d_k = D // n_heads
    cdt = jnp.dtype(compute_dtype)

    sa_wq, sa_bq, sa_wk, sa_bk, sa_wv, sa_bv, sa_wo, sa_bo = params["self_attn"]
    ca_wq, ca_bq, ca_wk, ca_bk, ca_wv, ca_bv, ca_wo, ca_bo = params["src_attn"]
    w1, b1, w2, b2 = params["ffn"]
    ln0_a, ln0_b = params["ln0"]
    ln1_a, ln1_b = params["ln1"]
    ln2_a, ln2_b = params["ln2"]
    d_ff = w1.shape[1]

    # Fuse Q,K,V (self) / K,V (cross) weights so each projection is one full-N
    # matmul; matmul weights are stored in the compute dtype (bf16 by default),
    # biases / LN params stay f32.  (In a real model these casts/concats are
    # done once at parameter-load time.)
    sa_wqkv = jnp.concatenate([sa_wq, sa_wk, sa_wv], axis=1).astype(cdt)
    sa_bqkv = jnp.concatenate([sa_bq, sa_bk, sa_bv], axis=1)
    ca_wkv = jnp.concatenate([ca_wk, ca_wv], axis=1).astype(cdt)
    ca_bkv = jnp.concatenate([ca_bk, ca_bv], axis=1)

    operands = (
        x, memory, tgt_mask, src_mask,
        sa_wqkv, sa_bqkv, sa_wo.astype(cdt), sa_bo,
        ca_wq.astype(cdt), ca_bq, ca_wkv, ca_bkv, ca_wo.astype(cdt), ca_bo,
        w1.astype(cdt), b1, w2.astype(cdt), b2,
        ln0_a, ln0_b, ln1_a, ln1_b, ln2_a, ln2_b,
    )

    in_specs = [
        pl.BlockSpec((1, T, D), lambda b: (b, 0, 0)),   # x
        pl.BlockSpec((1, S, D), lambda b: (b, 0, 0)),   # memory
        pl.BlockSpec((1, T, T), lambda b: (b, 0, 0)),   # tgt_mask
        pl.BlockSpec((1, T, S), lambda b: (b, 0, 0)),   # src_mask
    ] + [_full_spec(op.shape) for op in operands[4:]]   # weights / LN params

    scratch_shapes = [
        pltpu.VMEM((n_heads, T, d_k), cdt),   # Q heads (shared by both attns)
        pltpu.VMEM((n_heads, T, d_k), cdt),   # self-attn K heads
        pltpu.VMEM((n_heads, T, d_k), cdt),   # self-attn V heads
        pltpu.VMEM((n_heads, S, d_k), cdt),   # cross-attn K heads
        pltpu.VMEM((n_heads, S, d_k), cdt),   # cross-attn V heads
        pltpu.VMEM((T, D), cdt),              # merged-head context
    ]

    # VMEM budget: double-buffered operands + scratch + headroom, clamped to
    # the v7x 64 MiB physical ceiling (>= 32 MiB so small shapes are unaffected).
    op_bytes = sum(int(o.size) * o.dtype.itemsize for o in operands)
    scratch_bytes = (3 * n_heads * T * d_k + 2 * n_heads * S * d_k + T * D) \
        * cdt.itemsize
    vmem_limit = int(min(max(2 * op_bytes + scratch_bytes + (8 << 20),
                             32 << 20), 64 << 20))

    flops = 2 * B * (T * D * 3 * D            # self-attn fused QKV projection
                     + 2 * T * T * D          # self-attn scores + PV
                     + T * D * D              # self-attn output projection
                     + T * D * D              # cross-attn Q projection
                     + S * D * 2 * D          # cross-attn fused KV projection
                     + 2 * T * S * D          # cross-attn scores + PV
                     + T * D * D              # cross-attn output projection
                     + 2 * T * D * d_ff)      # FFN
    cost = pl.CostEstimate(
        flops=int(flops),
        transcendentals=int(B * n_heads * (T * T + T * S)),
        bytes_accessed=int(op_bytes + B * T * D * x.dtype.itemsize))

    kernel = functools.partial(_decoder_layer_kernel, n_heads=n_heads)
    return pl.pallas_call(
        kernel,
        out_shape=jax.ShapeDtypeStruct((B, T, D), x.dtype),
        grid=(B,),
        in_specs=in_specs,
        out_specs=pl.BlockSpec((1, T, D), lambda b: (b, 0, 0)),
        scratch_shapes=scratch_shapes,
        compiler_params=pltpu.CompilerParams(
            dimension_semantics=("parallel",),
            vmem_limit_bytes=vmem_limit),
        cost_estimate=cost,
    )(*operands)


# --------------------------- pure-JAX reference --------------------------------
def _ref_ln(x, a, b):
    d = x.shape[-1]
    mean = jnp.mean(x, -1, keepdims=True)
    var = jnp.sum((x - mean) ** 2, -1, keepdims=True) / (d - 1)
    return a * (x - mean) / (jnp.sqrt(var) + EPS) + b


def _ref_mha(q_in, kv_in, mask, w):
    wq, bq, wk, bk, wv, bv, wo, bo = w
    B, T, D = q_in.shape
    S = kv_in.shape[1]
    dk = D // N_HEADS
    q = (q_in @ wq + bq).reshape(B, T, N_HEADS, dk).transpose(0, 2, 1, 3)
    k = (kv_in @ wk + bk).reshape(B, S, N_HEADS, dk).transpose(0, 2, 1, 3)
    v = (kv_in @ wv + bv).reshape(B, S, N_HEADS, dk).transpose(0, 2, 1, 3)
    scores = jnp.einsum("bhtd,bhsd->bhts", q, k) / math.sqrt(dk)
    scores = jnp.where(mask[:, None] == 0.0, -1e9, scores)
    p = jax.nn.softmax(scores, axis=-1)
    o = jnp.einsum("bhts,bhsd->bhtd", p, v).transpose(0, 2, 1, 3).reshape(B, T, D)
    return o @ wo + bo


def decoder_layer_ref(x, memory, src_mask, tgt_mask, params):
    xn = _ref_ln(x, *params["ln0"])
    x = x + _ref_mha(xn, xn, tgt_mask, params["self_attn"])
    xn = _ref_ln(x, *params["ln1"])
    x = x + _ref_mha(xn, memory, src_mask, params["src_attn"])
    xn = _ref_ln(x, *params["ln2"])
    w1, b1, w2, b2 = params["ffn"]
    return x + (jnp.maximum(xn @ w1 + b1, 0.0) @ w2 + b2)


# ----------------------------------- main --------------------------------------
if __name__ == "__main__":
    B, T, S, D, D_FF = 2, 8, 8, 32, 64
    key = jax.random.PRNGKey(0)
    ks = iter(jax.random.split(key, 32))

    def rnd(shape, scale=0.05):
        return (scale * jax.random.normal(next(ks), shape)).astype(jnp.float32)

    def attn_params():
        return tuple(p for _ in range(4) for p in (rnd((D, D)), rnd((1, D))))

    params = {
        "self_attn": attn_params(),
        "src_attn": attn_params(),
        "ffn": (rnd((D, D_FF)), rnd((1, D_FF)), rnd((D_FF, D)), rnd((1, D))),
        # LayerNorm params: both a2 and b2 are torch.ones(feature) in __init__.
        "ln0": (jnp.ones((1, D), jnp.float32), jnp.ones((1, D), jnp.float32)),
        "ln1": (jnp.ones((1, D), jnp.float32), jnp.ones((1, D), jnp.float32)),
        "ln2": (jnp.ones((1, D), jnp.float32), jnp.ones((1, D), jnp.float32)),
    }

    x = jax.random.normal(next(ks), (B, T, D), dtype=jnp.float32)
    memory = jax.random.normal(next(ks), (B, S, D), dtype=jnp.float32)
    tgt_mask = jnp.broadcast_to(
        jnp.tril(jnp.ones((T, T), jnp.float32)), (B, T, T))
    src_mask = jnp.ones((B, T, S), jnp.float32).at[:, :, -1].set(0.0)

    ref = decoder_layer_ref(x, memory, src_mask, tgt_mask, params)

    # f32 MXU path: matches the PyTorch-equivalent reference tightly.
    out_f32 = jax.block_until_ready(
        decoder_layer(x, memory, src_mask, tgt_mask, params,
                      compute_dtype=jnp.float32))
    assert out_f32.shape == (B, T, D)
    assert jnp.allclose(out_f32, ref, rtol=1e-4, atol=1e-4), (
        float(jnp.max(jnp.abs(out_f32 - ref))))

    # bf16 MXU path (default / production): same semantics, looser tolerance.
    out_bf16 = jax.block_until_ready(
        decoder_layer(x, memory, src_mask, tgt_mask, params))
    assert out_bf16.shape == (B, T, D)
    assert jnp.allclose(out_bf16, ref, rtol=3e-2, atol=3e-2), (
        float(jnp.max(jnp.abs(out_bf16 - ref))))

    print("KERNEL_OK")
</pallas_src>

<mosaic_0001>
module attributes {stable_mosaic.version = 11 : i64} {
  func.func @_decoder_layer_kernel(%arg0: i32, %arg1: memref<1x8x32xf32, #tpu.memory_space<vmem>>, %arg2: memref<1x8x32xf32, #tpu.memory_space<vmem>>, %arg3: memref<1x8x8xf32, #tpu.memory_space<vmem>>, %arg4: memref<1x8x8xf32, #tpu.memory_space<vmem>>, %arg5: memref<32x96xf32, #tpu.memory_space<vmem>>, %arg6: memref<1x96xf32, #tpu.memory_space<vmem>>, %arg7: memref<32x32xf32, #tpu.memory_space<vmem>>, %arg8: memref<1x32xf32, #tpu.memory_space<vmem>>, %arg9: memref<32x32xf32, #tpu.memory_space<vmem>>, %arg10: memref<1x32xf32, #tpu.memory_space<vmem>>, %arg11: memref<32x64xf32, #tpu.memory_space<vmem>>, %arg12: memref<1x64xf32, #tpu.memory_space<vmem>>, %arg13: memref<32x32xf32, #tpu.memory_space<vmem>>, %arg14: memref<1x32xf32, #tpu.memory_space<vmem>>, %arg15: memref<32x64xf32, #tpu.memory_space<vmem>>, %arg16: memref<1x64xf32, #tpu.memory_space<vmem>>, %arg17: memref<64x32xf32, #tpu.memory_space<vmem>>, %arg18: memref<1x32xf32, #tpu.memory_space<vmem>>, %arg19: memref<1x32xf32, #tpu.memory_space<vmem>>, %arg20: memref<1x32xf32, #tpu.memory_space<vmem>>, %arg21: memref<1x32xf32, #tpu.memory_space<vmem>>, %arg22: memref<1x32xf32, #tpu.memory_space<vmem>>, %arg23: memref<1x32xf32, #tpu.memory_space<vmem>>, %arg24: memref<1x32xf32, #tpu.memory_space<vmem>>, %arg25: memref<1x8x32xf32, #tpu.memory_space<vmem>>, %arg26: memref<4x8x8xf32, #tpu.memory_space<vmem>>, %arg27: memref<4x8x8xf32, #tpu.memory_space<vmem>>, %arg28: memref<4x8x8xf32, #tpu.memory_space<vmem>>, %arg29: memref<4x8x8xf32, #tpu.memory_space<vmem>>, %arg30: memref<4x8x8xf32, #tpu.memory_space<vmem>>, %arg31: memref<8x32xf32, #tpu.memory_space<vmem>>) attributes {dimension_semantics = [#tpu.dimension_semantics<parallel>], iteration_bounds = array<i64: 2>, scalar_prefetch = 0 : i64, scratch_operands = 6 : i64, tpu.core_type = #tpu.core_type<tc>, window_params = [{transform_indices = @transform_0, window_bounds = array<i64: 1, 8, 32>}, {transform_indices = @transform_1, window_bounds = array<i64: 1, 8, 32>}, {transform_indices = @transform_2, window_bounds = array<i64: 1, 8, 8>}, {transform_indices = @transform_3, window_bounds = array<i64: 1, 8, 8>}, {pipeline_mode = #tpu.pipeline_mode<synchronous>, transform_indices = @transform_4, window_bounds = array<i64: 32, 96>}, {pipeline_mode = #tpu.pipeline_mode<synchronous>, transform_indices = @transform_5, window_bounds = array<i64: 1, 96>}, {pipeline_mode = #tpu.pipeline_mode<synchronous>, transform_indices = @transform_6, window_bounds = array<i64: 32, 32>}, {pipeline_mode = #tpu.pipeline_mode<synchronous>, transform_indices = @transform_7, window_bounds = array<i64: 1, 32>}, {pipeline_mode = #tpu.pipeline_mode<synchronous>, transform_indices = @transform_8, window_bounds = array<i64: 32, 32>}, {pipeline_mode = #tpu.pipeline_mode<synchronous>, transform_indices = @transform_9, window_bounds = array<i64: 1, 32>}, {pipeline_mode = #tpu.pipeline_mode<synchronous>, transform_indices = @transform_10, window_bounds = array<i64: 32, 64>}, {pipeline_mode = #tpu.pipeline_mode<synchronous>, transform_indices = @transform_11, window_bounds = array<i64: 1, 64>}, {pipeline_mode = #tpu.pipeline_mode<synchronous>, transform_indices = @transform_12, window_bounds = array<i64: 32, 32>}, {pipeline_mode = #tpu.pipeline_mode<synchronous>, transform_indices = @transform_13, window_bounds = array<i64: 1, 32>}, {pipeline_mode = #tpu.pipeline_mode<synchronous>, transform_indices = @transform_14, window_bounds = array<i64: 32, 64>}, {pipeline_mode = #tpu.pipeline_mode<synchronous>, transform_indices = @transform_15, window_bounds = array<i64: 1, 64>}, {pipeline_mode = #tpu.pipeline_mode<synchronous>, transform_indices = @transform_16, window_bounds = array<i64: 64, 32>}, {pipeline_mode = #tpu.pipeline_mode<synchronous>, transform_indices = @transform_17, window_bounds = array<i64: 1, 32>}, {pipeline_mode = #tpu.pipeline_mode<synchronous>, transform_indices = @transform_18, window_bounds = array<i64: 1, 32>}, {pipeline_mode = #tpu.pipeline_mode<synchronous>, transform_indices = @transform_19, window_bounds = array<i64: 1, 32>}, {pipeline_mode = #tpu.pipeline_mode<synchronous>, transform_indices = @transform_20, window_bounds = array<i64: 1, 32>}, {pipeline_mode = #tpu.pipeline_mode<synchronous>, transform_indices = @transform_21, window_bounds = array<i64: 1, 32>}, {pipeline_mode = #tpu.pipeline_mode<synchronous>, transform_indices = @transform_22, window_bounds = array<i64: 1, 32>}, {pipeline_mode = #tpu.pipeline_mode<synchronous>, transform_indices = @transform_23, window_bounds = array<i64: 1, 32>}, {transform_indices = @transform_24, window_bounds = array<i64: 1, 8, 32>}]} {
    %c0 = arith.constant 0 : index
    %c0_0 = arith.constant 0 : index
    %c0_1 = arith.constant 0 : index
    %0 = vector.load %arg1[%c0, %c0_0, %c0_1] : memref<1x8x32xf32, #tpu.memory_space<vmem>>, vector<1x8x32xf32>
    %1 = vector.shape_cast %0 : vector<1x8x32xf32> to vector<8x32xf32>
    %c0_2 = arith.constant 0 : index
    %c0_3 = arith.constant 0 : index
    %c0_4 = arith.constant 0 : index
    %2 = vector.load %arg2[%c0_2, %c0_3, %c0_4] : memref<1x8x32xf32, #tpu.memory_space<vmem>>, vector<1x8x32xf32>
    %3 = vector.shape_cast %2 : vector<1x8x32xf32> to vector<8x32xf32>
    %c0_5 = arith.constant 0 : index
    %c0_6 = arith.constant 0 : index
    %4 = vector.load %arg19[%c0_5, %c0_6] : memref<1x32xf32, #tpu.memory_space<vmem>>, vector<1x32xf32>
    %c0_7 = arith.constant 0 : index
    %c0_8 = arith.constant 0 : index
    %5 = vector.load %arg20[%c0_7, %c0_8] : memref<1x32xf32, #tpu.memory_space<vmem>>, vector<1x32xf32>
    %cst = arith.constant dense<0.000000e+00> : vector<8xf32>
    %6 = vector.multi_reduction <add>, %1, %cst [1] : vector<8x32xf32> to vector<8xf32>
    %7 = vector.shape_cast %6 : vector<8xf32> to vector<8x1xf32>
    %cst_9 = arith.constant 3.200000e+01 : f32
    %8 = vector.broadcast %cst_9 : f32 to vector<8x1xf32>
    %9 = arith.divf %7, %8 : vector<8x1xf32>
    %10 = vector.broadcast %9 : vector<8x1xf32> to vector<8x32xf32>
    %11 = arith.subf %1, %10 : vector<8x32xf32>
    %12 = arith.mulf %11, %11 : vector<8x32xf32>
    %cst_10 = arith.constant dense<0.000000e+00> : vector<8xf32>
    %13 = vector.multi_reduction <add>, %12, %cst_10 [1] : vector<8x32xf32> to vector<8xf32>
    %14 = vector.shape_cast %13 : vector<8xf32> to vector<8x1xf32>
    %cst_11 = arith.constant 3.100000e+01 : f32
    %15 = vector.broadcast %cst_11 : f32 to vector<8x1xf32>
    %16 = arith.divf %14, %15 : vector<8x1xf32>
    %17 = math.sqrt %16 : vector<8x1xf32>
    %cst_12 = arith.constant 9.99999997E-7 : f32
    %18 = vector.broadcast %cst_12 : f32 to vector<8x1xf32>
    %19 = arith.addf %17, %18 : vector<8x1xf32>
    %20 = tpu.reciprocal %19 : vector<8x1xf32> -> vector<8x1xf32>
    %21 = vector.broadcast %9 : vector<8x1xf32> to vector<8x32xf32>
    %22 = arith.subf %1, %21 : vector<8x32xf32>
    %23 = vector.broadcast %4 : vector<1x32xf32> to vector<8x32xf32>
    %24 = arith.mulf %23, %22 : vector<8x32xf32>
    %25 = vector.broadcast %20 : vector<8x1xf32> to vector<8x32xf32>
    %26 = arith.mulf %24, %25 : vector<8x32xf32>
    %27 = vector.broadcast %5 : vector<1x32xf32> to vector<8x32xf32>
    %28 = arith.addf %26, %27 : vector<8x32xf32>
    %c0_13 = arith.constant 0 : index
    %c0_14 = arith.constant 0 : index
    %29 = vector.load %arg5[%c0_13, %c0_14] : memref<32x96xf32, #tpu.memory_space<vmem>>, vector<32x96xf32>
    %cst_15 = arith.constant dense<0.000000e+00> : vector<8x96xf32>
    %30 = tpu.matmul %28, %29, %cst_15 {dimension_numbers = #tpu.dot_dimension_numbers<[1], [0], [0], [1], [0, 0, 1, 1], [], []>} : vector<8x32xf32>, vector<32x96xf32>, vector<8x96xf32> -> vector<8x96xf32>
    %c0_16 = arith.constant 0 : index
    %c0_17 = arith.constant 0 : index
    %31 = vector.load %arg6[%c0_16, %c0_17] : memref<1x96xf32, #tpu.memory_space<vmem>>, vector<1x96xf32>
    %32 = vector.broadcast %31 : vector<1x96xf32> to vector<8x96xf32>
    %33 = arith.addf %30, %32 : vector<8x96xf32>
    %34 = vector.extract_strided_slice %33 {offsets = [0, 0], sizes = [8, 32], strides = [1, 1]} : vector<8x96xf32> to vector<8x32xf32>
    %35 = vector.extract_strided_slice %33 {offsets = [0, 32], sizes = [8, 32], strides = [1, 1]} : vector<8x96xf32> to vector<8x32xf32>
    %36 = vector.extract_strided_slice %33 {offsets = [0, 64], sizes = [8, 32], strides = [1, 1]} : vector<8x96xf32> to vector<8x32xf32>
    %c0_18 = arith.constant 0 : index
    %c0_19 = arith.constant 0 : index
    %c0_20 = arith.constant 0 : index
    %37 = vector.load %arg3[%c0_18, %c0_19, %c0_20] : memref<1x8x8xf32, #tpu.memory_space<vmem>>, vector<1x8x8xf32>
    %38 = vector.shape_cast %37 : vector<1x8x8xf32> to vector<8x8xf32>
    %c0_21 = arith.constant 0 : index
    %c0_22 = arith.constant 0 : index
    %39 = vector.load %arg7[%c0_21, %c0_22] : memref<32x32xf32, #tpu.memory_space<vmem>>, vector<32x32xf32>
    %c0_23 = arith.constant 0 : index
    %c0_24 = arith.constant 0 : index
    %40 = vector.load %arg8[%c0_23, %c0_24] : memref<1x32xf32, #tpu.memory_space<vmem>>, vector<1x32xf32>
    %41 = vector.extract_strided_slice %34 {offsets = [0, 0], sizes = [8, 8], strides = [1, 1]} : vector<8x32xf32> to vector<8x8xf32>
    %c0_25 = arith.constant 0 : index
    %c0_26 = arith.constant 0 : index
    %c0_27 = arith.constant 0 : index
    %42 = vector.load %arg26[%c0_25, %c0_26, %c0_27] : memref<4x8x8xf32, #tpu.memory_space<vmem>>, vector<1x8x8xf32>
    %43 = vector.shape_cast %42 : vector<1x8x8xf32> to vector<8x8xf32>
    %44 = vector.shape_cast %41 : vector<8x8xf32> to vector<1x8x8xf32>
    tpu.vector_store %arg26[%c0_25, %c0_26, %c0_27], %44 {strides = array<i32>} : memref<4x8x8xf32, #tpu.memory_space<vmem>>, vector<1x8x8xf32>,
    %45 = vector.extract_strided_slice %35 {offsets = [0, 0], sizes = [8, 8], strides = [1, 1]} : vector<8x32xf32> to vector<8x8xf32>
    %c0_28 = arith.constant 0 : index
    %c0_29 = arith.constant 0 : index
    %c0_30 = arith.constant 0 : index
    %46 = vector.load %arg27[%c0_28, %c0_29, %c0_30] : memref<4x8x8xf32, #tpu.memory_space<vmem>>, vector<1x8x8xf32>
    %47 = vector.shape_cast %46 : vector<1x8x8xf32> to vector<8x8xf32>
    %48 = vector.shape_cast %45 : vector<8x8xf32> to vector<1x8x8xf32>
    tpu.vector_store %arg27[%c0_28, %c0_29, %c0_30], %48 {strides = array<i32>} : memref<4x8x8xf32, #tpu.memory_space<vmem>>, vector<1x8x8xf32>,
    %49 = vector.extract_strided_slice %36 {offsets = [0, 0], sizes = [8, 8], strides = [1, 1]} : vector<8x32xf32> to vector<8x8xf32>
    %c0_31 = arith.constant 0 : index
    %c0_32 = arith.constant 0 : index
    %c0_33 = arith.constant 0 : index
    %50 = vector.load %arg28[%c0_31, %c0_32, %c0_33] : memref<4x8x8xf32, #tpu.memory_space<vmem>>, vector<1x8x8xf32>
    %51 = vector.shape_cast %50 : vector<1x8x8xf32> to vector<8x8xf32>
    %52 = vector.shape_cast %49 : vector<8x8xf32> to vector<1x8x8xf32>
    tpu.vector_store %arg28[%c0_31, %c0_32, %c0_33], %52 {strides = array<i32>} : memref<4x8x8xf32, #tpu.memory_space<vmem>>, vector<1x8x8xf32>,
    %53 = vector.extract_strided_slice %34 {offsets = [0, 8], sizes = [8, 8], strides = [1, 1]} : vector<8x32xf32> to vector<8x8xf32>
    %c1 = arith.constant 1 : index
    %c0_34 = arith.constant 0 : index
    %c0_35 = arith.constant 0 : index
    %54 = vector.load %arg26[%c1, %c0_34, %c0_35] : memref<4x8x8xf32, #tpu.memory_space<vmem>>, vector<1x8x8xf32>
    %55 = vector.shape_cast %54 : vector<1x8x8xf32> to vector<8x8xf32>
    %56 = vector.shape_cast %53 : vector<8x8xf32> to vector<1x8x8xf32>
    tpu.vector_store %arg26[%c1, %c0_34, %c0_35], %56 {strides = array<i32>} : memref<4x8x8xf32, #tpu.memory_space<vmem>>, vector<1x8x8xf32>,
    %57 = vector.extract_strided_slice %35 {offsets = [0, 8], sizes = [8, 8], strides = [1, 1]} : vector<8x32xf32> to vector<8x8xf32>
    %c1_36 = arith.constant 1 : index
    %c0_37 = arith.constant 0 : index
    %c0_38 = arith.constant 0 : index
    %58 = vector.load %arg27[%c1_36, %c0_37, %c0_38] : memref<4x8x8xf32, #tpu.memory_space<vmem>>, vector<1x8x8xf32>
    %59 = vector.shape_cast %58 : vector<1x8x8xf32> to vector<8x8xf32>
    %60 = vector.shape_cast %57 : vector<8x8xf32> to vector<1x8x8xf32>
    tpu.vector_store %arg27[%c1_36, %c0_37, %c0_38], %60 {strides = array<i32>} : memref<4x8x8xf32, #tpu.memory_space<vmem>>, vector<1x8x8xf32>,
    %61 = vector.extract_strided_slice %36 {offsets = [0, 8], sizes = [8, 8], strides = [1, 1]} : vector<8x32xf32> to vector<8x8xf32>
    %c1_39 = arith.constant 1 : index
    %c0_40 = arith.constant 0 : index
    %c0_41 = arith.constant 0 : index
    %62 = vector.load %arg28[%c1_39, %c0_40, %c0_41] : memref<4x8x8xf32, #tpu.memory_space<vmem>>, vector<1x8x8xf32>
    %63 = vector.shape_cast %62 : vector<1x8x8xf32> to vector<8x8xf32>
    %64 = vector.shape_cast %61 : vector<8x8xf32> to vector<1x8x8xf32>
    tpu.vector_store %arg28[%c1_39, %c0_40, %c0_41], %64 {strides = array<i32>} : memref<4x8x8xf32, #tpu.memory_space<vmem>>, vector<1x8x8xf32>,
    %65 = vector.extract_strided_slice %34 {offsets = [0, 16], sizes = [8, 8], strides = [1, 1]} : vector<8x32xf32> to vector<8x8xf32>
    %c2 = arith.constant 2 : index
    %c0_42 = arith.constant 0 : index
    %c0_43 = arith.constant 0 : index
    %66 = vector.load %arg26[%c2, %c0_42, %c0_43] : memref<4x8x8xf32, #tpu.memory_space<vmem>>, vector<1x8x8xf32>
    %67 = vector.shape_cast %66 : vector<1x8x8xf32> to vector<8x8xf32>
    %68 = vector.shape_cast %65 : vector<8x8xf32> to vector<1x8x8xf32>
    tpu.vector_store %arg26[%c2, %c0_42, %c0_43], %68 {strides = array<i32>} : memref<4x8x8xf32, #tpu.memory_space<vmem>>, vector<1x8x8xf32>,
    %69 = vector.extract_strided_slice %35 {offsets = [0, 16], sizes = [8, 8], strides = [1, 1]} : vector<8x32xf32> to vector<8x8xf32>
    %c2_44 = arith.constant 2 : index
    %c0_45 = arith.constant 0 : index
    %c0_46 = arith.constant 0 : index
    %70 = vector.load %arg27[%c2_44, %c0_45, %c0_46] : memref<4x8x8xf32, #tpu.memory_space<vmem>>, vector<1x8x8xf32>
    %71 = vector.shape_cast %70 : vector<1x8x8xf32> to vector<8x8xf32>
    %72 = vector.shape_cast %69 : vector<8x8xf32> to vector<1x8x8xf32>
    tpu.vector_store %arg27[%c2_44, %c0_45, %c0_46], %72 {strides = array<i32>} : memref<4x8x8xf32, #tpu.memory_space<vmem>>, vector<1x8x8xf32>,
    %73 = vector.extract_strided_slice %36 {offsets = [0, 16], sizes = [8, 8], strides = [1, 1]} : vector<8x32xf32> to vector<8x8xf32>
    %c2_47 = arith.constant 2 : index
    %c0_48 = arith.constant 0 : index
    %c0_49 = arith.constant 0 : index
    %74 = vector.load %arg28[%c2_47, %c0_48, %c0_49] : memref<4x8x8xf32, #tpu.memory_space<vmem>>, vector<1x8x8xf32>
    %75 = vector.shape_cast %74 : vector<1x8x8xf32> to vector<8x8xf32>
    %76 = vector.shape_cast %73 : vector<8x8xf32> to vector<1x8x8xf32>
    tpu.vector_store %arg28[%c2_47, %c0_48, %c0_49], %76 {strides = array<i32>} : memref<4x8x8xf32, #tpu.memory_space<vmem>>, vector<1x8x8xf32>,
    %77 = vector.extract_strided_slice %34 {offsets = [0, 24], sizes = [8, 8], strides = [1, 1]} : vector<8x32xf32> to vector<8x8xf32>
    %c3 = arith.constant 3 : index
    %c0_50 = arith.constant 0 : index
    %c0_51 = arith.constant 0 : index
    %78 = vector.load %arg26[%c3, %c0_50, %c0_51] : memref<4x8x8xf32, #tpu.memory_space<vmem>>, vector<1x8x8xf32>
    %79 = vector.shape_cast %78 : vector<1x8x8xf32> to vector<8x8xf32>
    %80 = vector.shape_cast %77 : vector<8x8xf32> to vector<1x8x8xf32>
    tpu.vector_store %arg26[%c3, %c0_50, %c0_51], %80 {strides = array<i32>} : memref<4x8x8xf32, #tpu.memory_space<vmem>>, vector<1x8x8xf32>,
    %81 = vector.extract_strided_slice %35 {offsets = [0, 24], sizes = [8, 8], strides = [1, 1]} : vector<8x32xf32> to vector<8x8xf32>
    %c3_52 = arith.constant 3 : index
    %c0_53 = arith.constant 0 : index
    %c0_54 = arith.constant 0 : index
    %82 = vector.load %arg27[%c3_52, %c0_53, %c0_54] : memref<4x8x8xf32, #tpu.memory_space<vmem>>, vector<1x8x8xf32>
    %83 = vector.shape_cast %82 : vector<1x8x8xf32> to vector<8x8xf32>
    %84 = vector.shape_cast %81 : vector<8x8xf32> to vector<1x8x8xf32>
    tpu.vector_store %arg27[%c3_52, %c0_53, %c0_54], %84 {strides = array<i32>} : memref<4x8x8xf32, #tpu.memory_space<vmem>>, vector<1x8x8xf32>,
    %85 = vector.extract_strided_slice %36 {offsets = [0, 24], sizes = [8, 8], strides = [1, 1]} : vector<8x32xf32> to vector<8x8xf32>
    %c3_55 = arith.constant 3 : index
    %c0_56 = arith.constant 0 : index
    %c0_57 = arith.constant 0 : index
    %86 = vector.load %arg28[%c3_55, %c0_56, %c0_57] : memref<4x8x8xf32, #tpu.memory_space<vmem>>, vector<1x8x8xf32>
    %87 = vector.shape_cast %86 : vector<1x8x8xf32> to vector<8x8xf32>
    %88 = vector.shape_cast %85 : vector<8x8xf32> to vector<1x8x8xf32>
    tpu.vector_store %arg28[%c3_55, %c0_56, %c0_57], %88 {strides = array<i32>} : memref<4x8x8xf32, #tpu.memory_space<vmem>>, vector<1x8x8xf32>,
    %c0_58 = arith.constant 0 : index
    %c0_59 = arith.constant 0 : index
    %c0_60 = arith.constant 0 : index
    %89 = vector.load %arg26[%c0_58, %c0_59, %c0_60] : memref<4x8x8xf32, #tpu.memory_space<vmem>>, vector<4x8x8xf32>
    %c0_61 = arith.constant 0 : index
    %c0_62 = arith.constant 0 : index
    %c0_63 = arith.constant 0 : index
    %90 = vector.load %arg27[%c0_61, %c0_62, %c0_63] : memref<4x8x8xf32, #tpu.memory_space<vmem>>, vector<4x8x8xf32>
    "tpu.trace_start"() <{level = 10 : i32, message = "htk,hsk->hts"}> : () -> ()
    %cst_64 = arith.constant dense<0.000000e+00> : vector<4x8x8xf32>
    %91 = tpu.matmul %89, %90, %cst_64 {dimension_numbers = #tpu.dot_dimension_numbers<[2], [2], [1], [1], [0, 0, 0, 1, 1, 1], [0], [0]>} : vector<4x8x8xf32>, vector<4x8x8xf32>, vector<4x8x8xf32> -> vector<4x8x8xf32>
    "tpu.trace_stop"() : () -> ()
    %cst_65 = arith.constant 0.353553385 : f32
    %92 = vector.broadcast %cst_65 : f32 to vector<4x8x8xf32>
    %93 = arith.mulf %91, %92 : vector<4x8x8xf32>
    %94 = vector.shape_cast %38 : vector<8x8xf32> to vector<1x8x8xf32>
    %cst_66 = arith.constant 0.000000e+00 : f32
    %95 = vector.broadcast %cst_66 : f32 to vector<1x8x8xf32>
    %96 = arith.cmpf oeq, %94, %95 : vector<1x8x8xf32>
    %cst_67 = arith.constant -1.000000e+09 : f32
    %97 = vector.shape_cast %96 : vector<1x8x8xi1> to vector<1x8x8xi1>
    %98 = vector.broadcast %97 : vector<1x8x8xi1> to vector<4x8x8xi1>
    %99 = vector.broadcast %cst_67 : f32 to vector<4x8x8xf32>
    %100 = arith.select %98, %99, %93 : vector<4x8x8xi1>, vector<4x8x8xf32>
    %cst_68 = arith.constant dense<0xFF800000> : vector<4x8xf32>
    %101 = vector.multi_reduction <maximumf>, %100, %cst_68 [2] : vector<4x8x8xf32> to vector<4x8xf32>
    %102 = vector.shape_cast %101 : vector<4x8xf32> to vector<4x8x1xf32>
    %103 = vector.broadcast %102 : vector<4x8x1xf32> to vector<4x8x8xf32>
    %104 = arith.subf %100, %103 : vector<4x8x8xf32>
    %105 = math.exp %104 : vector<4x8x8xf32>
    %cst_69 = arith.constant dense<0.000000e+00> : vector<4x8xf32>
    %106 = vector.multi_reduction <add>, %105, %cst_69 [2] : vector<4x8x8xf32> to vector<4x8xf32>
    %107 = vector.shape_cast %106 : vector<4x8xf32> to vector<4x8x1xf32>
    %108 = tpu.reciprocal %107 : vector<4x8x1xf32> -> vector<4x8x1xf32>
    %109 = vector.broadcast %108 : vector<4x8x1xf32> to vector<4x8x8xf32>
    %110 = arith.mulf %105, %109 : vector<4x8x8xf32>
    %c0_70 = arith.constant 0 : index
    %c0_71 = arith.constant 0 : index
    %c0_72 = arith.constant 0 : index
    %111 = vector.load %arg28[%c0_70, %c0_71, %c0_72] : memref<4x8x8xf32, #tpu.memory_space<vmem>>, vector<4x8x8xf32>
    "tpu.trace_start"() <{level = 10 : i32, message = "hts,hsk->htk"}> : () -> ()
    %cst_73 = arith.constant dense<0.000000e+00> : vector<4x8x8xf32>
    %112 = tpu.matmul %110, %111, %cst_73 {dimension_numbers = #tpu.dot_dimension_numbers<[2], [1], [1], [2], [0, 0, 0, 1, 1, 2], [0], [0]>} : vector<4x8x8xf32>, vector<4x8x8xf32>, vector<4x8x8xf32> -> vector<4x8x8xf32>
    "tpu.trace_stop"() : () -> ()
    %113 = vector.extract_strided_slice %112 {offsets = [0, 0, 0], sizes = [1, 8, 8], strides = [1, 1, 1]} : vector<4x8x8xf32> to vector<1x8x8xf32>
    %114 = vector.shape_cast %113 : vector<1x8x8xf32> to vector<8x8xf32>
    %c0_74 = arith.constant 0 : index
    %c0_75 = arith.constant 0 : index
    %115 = vector.load %arg31[%c0_74, %c0_75] : memref<8x32xf32, #tpu.memory_space<vmem>>, vector<8x8xf32>
    tpu.vector_store %arg31[%c0_74, %c0_75], %114 {strides = array<i32>} : memref<8x32xf32, #tpu.memory_space<vmem>>, vector<8x8xf32>,
    %116 = vector.extract_strided_slice %112 {offsets = [1, 0, 0], sizes = [1, 8, 8], strides = [1, 1, 1]} : vector<4x8x8xf32> to vector<1x8x8xf32>
    %117 = vector.shape_cast %116 : vector<1x8x8xf32> to vector<8x8xf32>
    %c0_76 = arith.constant 0 : index
    %c8 = arith.constant 8 : index
    %118 = vector.load %arg31[%c0_76, %c8] : memref<8x32xf32, #tpu.memory_space<vmem>>, vector<8x8xf32>
    tpu.vector_store %arg31[%c0_76, %c8], %117 {strides = array<i32>} : memref<8x32xf32, #tpu.memory_space<vmem>>, vector<8x8xf32>,
    %119 = vector.extract_strided_slice %112 {offsets = [2, 0, 0], sizes = [1, 8, 8], strides = [1, 1, 1]} : vector<4x8x8xf32> to vector<1x8x8xf32>
    %120 = vector.shape_cast %119 : vector<1x8x8xf32> to vector<8x8xf32>
    %c0_77 = arith.constant 0 : index
    %c16 = arith.constant 16 : index
    %121 = vector.load %arg31[%c0_77, %c16] : memref<8x32xf32, #tpu.memory_space<vmem>>, vector<8x8xf32>
    tpu.vector_store %arg31[%c0_77, %c16], %120 {strides = array<i32>} : memref<8x32xf32, #tpu.memory_space<vmem>>, vector<8x8xf32>,
    %122 = vector.extract_strided_slice %112 {offsets = [3, 0, 0], sizes = [1, 8, 8], strides = [1, 1, 1]} : vector<4x8x8xf32> to vector<1x8x8xf32>
    %123 = vector.shape_cast %122 : vector<1x8x8xf32> to vector<8x8xf32>
    %c0_78 = arith.constant 0 : index
    %c24 = arith.constant 24 : index
    %124 = vector.load %arg31[%c0_78, %c24] : memref<8x32xf32, #tpu.memory_space<vmem>>, vector<8x8xf32>
    tpu.vector_store %arg31[%c0_78, %c24], %123 {strides = array<i32>} : memref<8x32xf32, #tpu.memory_space<vmem>>, vector<8x8xf32>,
    %c0_79 = arith.constant 0 : index
    %c0_80 = arith.constant 0 : index
    %125 = vector.load %arg31[%c0_79, %c0_80] : memref<8x32xf32, #tpu.memory_space<vmem>>, vector<8x32xf32>
    %cst_81 = arith.constant dense<0.000000e+00> : vector<8x32xf32>
    %126 = tpu.matmul %125, %39, %cst_81 {dimension_numbers = #tpu.dot_dimension_numbers<[1], [0], [0], [1], [0, 0, 1, 1], [], []>} : vector<8x32xf32>, vector<32x32xf32>, vector<8x32xf32> -> vector<8x32xf32>
    %127 = vector.broadcast %40 : vector<1x32xf32> to vector<8x32xf32>
    %128 = arith.addf %126, %127 : vector<8x32xf32>
    %129 = arith.addf %1, %128 : vector<8x32xf32>
    %c0_82 = arith.constant 0 : index
    %c0_83 = arith.constant 0 : index
    %130 = vector.load %arg21[%c0_82, %c0_83] : memref<1x32xf32, #tpu.memory_space<vmem>>, vector<1x32xf32>
    %c0_84 = arith.constant 0 : index
    %c0_85 = arith.constant 0 : index
    %131 = vector.load %arg22[%c0_84, %c0_85] : memref<1x32xf32, #tpu.memory_space<vmem>>, vector<1x32xf32>
    %cst_86 = arith.constant dense<0.000000e+00> : vector<8xf32>
    %132 = vector.multi_reduction <add>, %129, %cst_86 [1] : vector<8x32xf32> to vector<8xf32>
    %133 = vector.shape_cast %132 : vector<8xf32> to vector<8x1xf32>
    %cst_87 = arith.constant 3.200000e+01 : f32
    %134 = vector.broadcast %cst_87 : f32 to vector<8x1xf32>
    %135 = arith.divf %133, %134 : vector<8x1xf32>
    %136 = vector.broadcast %135 : vector<8x1xf32> to vector<8x32xf32>
    %137 = arith.subf %129, %136 : vector<8x32xf32>
    %138 = arith.mulf %137, %137 : vector<8x32xf32>
    %cst_88 = arith.constant dense<0.000000e+00> : vector<8xf32>
    %139 = vector.multi_reduction <add>, %138, %cst_88 [1] : vector<8x32xf32> to vector<8xf32>
    %140 = vector.shape_cast %139 : vector<8xf32> to vector<8x1xf32>
    %cst_89 = arith.constant 3.100000e+01 : f32
    %141 = vector.broadcast %cst_89 : f32 to vector<8x1xf32>
    %142 = arith.divf %140, %141 : vector<8x1xf32>
    %143 = math.sqrt %142 : vector<8x1xf32>
    %cst_90 = arith.constant 9.99999997E-7 : f32
    %144 = vector.broadcast %cst_90 : f32 to vector<8x1xf32>
    %145 = arith.addf %143, %144 : vector<8x1xf32>
    %146 = tpu.reciprocal %145 : vector<8x1xf32> -> vector<8x1xf32>
    %147 = vector.broadcast %135 : vector<8x1xf32> to vector<8x32xf32>
    %148 = arith.subf %129, %147 : vector<8x32xf32>
    %149 = vector.broadcast %130 : vector<1x32xf32> to vector<8x32xf32>
    %150 = arith.mulf %149, %148 : vector<8x32xf32>
    %151 = vector.broadcast %146 : vector<8x1xf32> to vector<8x32xf32>
    %152 = arith.mulf %150, %151 : vector<8x32xf32>
    %153 = vector.broadcast %131 : vector<1x32xf32> to vector<8x32xf32>
    %154 = arith.addf %152, %153 : vector<8x32xf32>
    %c0_91 = arith.constant 0 : index
    %c0_92 = arith.constant 0 : index
    %155 = vector.load %arg9[%c0_91, %c0_92] : memref<32x32xf32, #tpu.memory_space<vmem>>, vector<32x32xf32>
    %cst_93 = arith.constant dense<0.000000e+00> : vector<8x32xf32>
    %156 = tpu.matmul %154, %155, %cst_93 {dimension_numbers = #tpu.dot_dimension_numbers<[1], [0], [0], [1], [0, 0, 1, 1], [], []>} : vector<8x32xf32>, vector<32x32xf32>, vector<8x32xf32> -> vector<8x32xf32>
    %c0_94 = arith.constant 0 : index
    %c0_95 = arith.constant 0 : index
    %157 = vector.load %arg10[%c0_94, %c0_95] : memref<1x32xf32, #tpu.memory_space<vmem>>, vector<1x32xf32>
    %158 = vector.broadcast %157 : vector<1x32xf32> to vector<8x32xf32>
    %159 = arith.addf %156, %158 : vector<8x32xf32>
    %c0_96 = arith.constant 0 : index
    %c0_97 = arith.constant 0 : index
    %160 = vector.load %arg11[%c0_96, %c0_97] : memref<32x64xf32, #tpu.memory_space<vmem>>, vector<32x64xf32>
    %cst_98 = arith.constant dense<0.000000e+00> : vector<8x64xf32>
    %161 = tpu.matmul %3, %160, %cst_98 {dimension_numbers = #tpu.dot_dimension_numbers<[1], [0], [0], [1], [0, 0, 1, 1], [], []>} : vector<8x32xf32>, vector<32x64xf32>, vector<8x64xf32> -> vector<8x64xf32>
    %c0_99 = arith.constant 0 : index
    %c0_100 = arith.constant 0 : index
    %162 = vector.load %arg12[%c0_99, %c0_100] : memref<1x64xf32, #tpu.memory_space<vmem>>, vector<1x64xf32>
    %163 = vector.broadcast %162 : vector<1x64xf32> to vector<8x64xf32>
    %164 = arith.addf %161, %163 : vector<8x64xf32>
    %165 = vector.extract_strided_slice %164 {offsets = [0, 0], sizes = [8, 32], strides = [1, 1]} : vector<8x64xf32> to vector<8x32xf32>
    %166 = vector.extract_strided_slice %164 {offsets = [0, 32], sizes = [8, 32], strides = [1, 1]} : vector<8x64xf32> to vector<8x32xf32>
    %c0_101 = arith.constant 0 : index
    %c0_102 = arith.constant 0 : index
    %c0_103 = arith.constant 0 : index
    %167 = vector.load %arg4[%c0_101, %c0_102, %c0_103] : memref<1x8x8xf32, #tpu.memory_space<vmem>>, vector<1x8x8xf32>
    %168 = vector.shape_cast %167 : vector<1x8x8xf32> to vector<8x8xf32>
    %c0_104 = arith.constant 0 : index
    %c0_105 = arith.constant 0 : index
    %169 = vector.load %arg13[%c0_104, %c0_105] : memref<32x32xf32, #tpu.memory_space<vmem>>, vector<32x32xf32>
    %c0_106 = arith.constant 0 : index
    %c0_107 = arith.constant 0 : index
    %170 = vector.load %arg14[%c0_106, %c0_107] : memref<1x32xf32, #tpu.memory_space<vmem>>, vector<1x32xf32>
    %171 = vector.extract_strided_slice %159 {offsets = [0, 0], sizes = [8, 8], strides = [1, 1]} : vector<8x32xf32> to vector<8x8xf32>
    %c0_108 = arith.constant 0 : index
    %c0_109 = arith.constant 0 : index
    %c0_110 = arith.constant 0 : index
    %172 = vector.load %arg26[%c0_108, %c0_109, %c0_110] : memref<4x8x8xf32, #tpu.memory_space<vmem>>, vector<1x8x8xf32>
    %173 = vector.shape_cast %172 : vector<1x8x8xf32> to vector<8x8xf32>
    %174 = vector.shape_cast %171 : vector<8x8xf32> to vector<1x8x8xf32>
    tpu.vector_store %arg26[%c0_108, %c0_109, %c0_110], %174 {strides = array<i32>} : memref<4x8x8xf32, #tpu.memory_space<vmem>>, vector<1x8x8xf32>,
    %175 = vector.extract_strided_slice %165 {offsets = [0, 0], sizes = [8, 8], strides = [1, 1]} : vector<8x32xf32> to vector<8x8xf32>
    %c0_111 = arith.constant 0 : index
    %c0_112 = arith.constant 0 : index
    %c0_113 = arith.constant 0 : index
    %176 = vector.load %arg29[%c0_111, %c0_112, %c0_113] : memref<4x8x8xf32, #tpu.memory_space<vmem>>, vector<1x8x8xf32>
    %177 = vector.shape_cast %176 : vector<1x8x8xf32> to vector<8x8xf32>
    %178 = vector.shape_cast %175 : vector<8x8xf32> to vector<1x8x8xf32>
    tpu.vector_store %arg29[%c0_111, %c0_112, %c0_113], %178 {strides = array<i32>} : memref<4x8x8xf32, #tpu.memory_space<vmem>>, vector<1x8x8xf32>,
    %179 = vector.extract_strided_slice %166 {offsets = [0, 0], sizes = [8, 8], strides = [1, 1]} : vector<8x32xf32> to vector<8x8xf32>
    %c0_114 = arith.constant 0 : index
    %c0_115 = arith.constant 0 : index
    %c0_116 = arith.constant 0 : index
    %180 = vector.load %arg30[%c0_114, %c0_115, %c0_116] : memref<4x8x8xf32, #tpu.memory_space<vmem>>, vector<1x8x8xf32>
    %181 = vector.shape_cast %180 : vector<1x8x8xf32> to vector<8x8xf32>
    %182 = vector.shape_cast %179 : vector<8x8xf32> to vector<1x8x8xf32>
    tpu.vector_store %arg30[%c0_114, %c0_115, %c0_116], %182 {strides = array<i32>} : memref<4x8x8xf32, #tpu.memory_space<vmem>>, vector<1x8x8xf32>,
    %183 = vector.extract_strided_slice %159 {offsets = [0, 8], sizes = [8, 8], strides = [1, 1]} : vector<8x32xf32> to vector<8x8xf32>
    %c1_117 = arith.constant 1 : index
    %c0_118 = arith.constant 0 : index
    %c0_119 = arith.constant 0 : index
    %184 = vector.load %arg26[%c1_117, %c0_118, %c0_119] : memref<4x8x8xf32, #tpu.memory_space<vmem>>, vector<1x8x8xf32>
    %185 = vector.shape_cast %184 : vector<1x8x8xf32> to vector<8x8xf32>
    %186 = vector.shape_cast %183 : vector<8x8xf32> to vector<1x8x8xf32>
    tpu.vector_store %arg26[%c1_117, %c0_118, %c0_119], %186 {strides = array<i32>} : memref<4x8x8xf32, #tpu.memory_space<vmem>>, vector<1x8x8xf32>,
    %187 = vector.extract_strided_slice %165 {offsets = [0, 8], sizes = [8, 8], strides = [1, 1]} : vector<8x32xf32> to vector<8x8xf32>
    %c1_120 = arith.constant 1 : index
    %c0_121 = arith.constant 0 : index
    %c0_122 = arith.constant 0 : index
    %188 = vector.load %arg29[%c1_120, %c0_121, %c0_122] : memref<4x8x8xf32, #tpu.memory_space<vmem>>, vector<1x8x8xf32>
    %189 = vector.shape_cast %188 : vector<1x8x8xf32> to vector<8x8xf32>
    %190 = vector.shape_cast %187 : vector<8x8xf32> to vector<1x8x8xf32>
    tpu.vector_store %arg29[%c1_120, %c0_121, %c0_122], %190 {strides = array<i32>} : memref<4x8x8xf32, #tpu.memory_space<vmem>>, vector<1x8x8xf32>,
    %191 = vector.extract_strided_slice %166 {offsets = [0, 8], sizes = [8, 8], strides = [1, 1]} : vector<8x32xf32> to vector<8x8xf32>
    %c1_123 = arith.constant 1 : index
    %c0_124 = arith.constant 0 : index
    %c0_125 = arith.constant 0 : index
    %192 = vector.load %arg30[%c1_123, %c0_124, %c0_125] : memref<4x8x8xf32, #tpu.memory_space<vmem>>, vector<1x8x8xf32>
    %193 = vector.shape_cast %192 : vector<1x8x8xf32> to vector<8x8xf32>
    %194 = vector.shape_cast %191 : vector<8x8xf32> to vector<1x8x8xf32>
    tpu.vector_store %arg30[%c1_123, %c0_124, %c0_125], %194 {strides = array<i32>} : memref<4x8x8xf32, #tpu.memory_space<vmem>>, vector<1x8x8xf32>,
    %195 = vector.extract_strided_slice %159 {offsets = [0, 16], sizes = [8, 8], strides = [1, 1]} : vector<8x32xf32> to vector<8x8xf32>
    %c2_126 = arith.constant 2 : index
    %c0_127 = arith.constant 0 : index
    %c0_128 = arith.constant 0 : index
    %196 = vector.load %arg26[%c2_126, %c0_127, %c0_128] : memref<4x8x8xf32, #tpu.memory_space<vmem>>, vector<1x8x8xf32>
    %197 = vector.shape_cast %196 : vector<1x8x8xf32> to vector<8x8xf32>
    %198 = vector.shape_cast %195 : vector<8x8xf32> to vector<1x8x8xf32>
    tpu.vector_store %arg26[%c2_126, %c0_127, %c0_128], %198 {strides = array<i32>} : memref<4x8x8xf32, #tpu.memory_space<vmem>>, vector<1x8x8xf32>,
    %199 = vector.extract_strided_slice %165 {offsets = [0, 16], sizes = [8, 8], strides = [1, 1]} : vector<8x32xf32> to vector<8x8xf32>
    %c2_129 = arith.constant 2 : index
    %c0_130 = arith.constant 0 : index
    %c0_131 = arith.constant 0 : index
    %200 = vector.load %arg29[%c2_129, %c0_130, %c0_131] : memref<4x8x8xf32, #tpu.memory_space<vmem>>, vector<1x8x8xf32>
    %201 = vector.shape_cast %200 : vector<1x8x8xf32> to vector<8x8xf32>
    %202 = vector.shape_cast %199 : vector<8x8xf32> to vector<1x8x8xf32>
    tpu.vector_store %arg29[%c2_129, %c0_130, %c0_131], %202 {strides = array<i32>} : memref<4x8x8xf32, #tpu.memory_space<vmem>>, vector<1x8x8xf32>,
    %203 = vector.extract_strided_slice %166 {offsets = [0, 16], sizes = [8, 8], strides = [1, 1]} : vector<8x32xf32> to vector<8x8xf32>
    %c2_132 = arith.constant 2 : index
    %c0_133 = arith.constant 0 : index
    %c0_134 = arith.constant 0 : index
    %204 = vector.load %arg30[%c2_132, %c0_133, %c0_134] : memref<4x8x8xf32, #tpu.memory_space<vmem>>, vector<1x8x8xf32>
    %205 = vector.shape_cast %204 : vector<1x8x8xf32> to vector<8x8xf32>
    %206 = vector.shape_cast %203 : vector<8x8xf32> to vector<1x8x8xf32>
    tpu.vector_store %arg30[%c2_132, %c0_133, %c0_134], %206 {strides = array<i32>} : memref<4x8x8xf32, #tpu.memory_space<vmem>>, vector<1x8x8xf32>,
    %207 = vector.extract_strided_slice %159 {offsets = [0, 24], sizes = [8, 8], strides = [1, 1]} : vector<8x32xf32> to vector<8x8xf32>
    %c3_135 = arith.constant 3 : index
    %c0_136 = arith.constant 0 : index
    %c0_137 = arith.constant 0 : index
    %208 = vector.load %arg26[%c3_135, %c0_136, %c0_137] : memref<4x8x8xf32, #tpu.memory_space<vmem>>, vector<1x8x8xf32>
    %209 = vector.shape_cast %208 : vector<1x8x8xf32> to vector<8x8xf32>
    %210 = vector.shape_cast %207 : vector<8x8xf32> to vector<1x8x8xf32>
    tpu.vector_store %arg26[%c3_135, %c0_136, %c0_137], %210 {strides = array<i32>} : memref<4x8x8xf32, #tpu.memory_space<vmem>>, vector<1x8x8xf32>,
    %211 = vector.extract_strided_slice %165 {offsets = [0, 24], sizes = [8, 8], strides = [1, 1]} : vector<8x32xf32> to vector<8x8xf32>
    %c3_138 = arith.constant 3 : index
    %c0_139 = arith.constant 0 : index
    %c0_140 = arith.constant 0 : index
    %212 = vector.load %arg29[%c3_138, %c0_139, %c0_140] : memref<4x8x8xf32, #tpu.memory_space<vmem>>, vector<1x8x8xf32>
    %213 = vector.shape_cast %212 : vector<1x8x8xf32> to vector<8x8xf32>
    %214 = vector.shape_cast %211 : vector<8x8xf32> to vector<1x8x8xf32>
    tpu.vector_store %arg29[%c3_138, %c0_139, %c0_140], %214 {strides = array<i32>} : memref<4x8x8xf32, #tpu.memory_space<vmem>>, vector<1x8x8xf32>,
    %215 = vector.extract_strided_slice %166 {offsets = [0, 24], sizes = [8, 8], strides = [1, 1]} : vector<8x32xf32> to vector<8x8xf32>
    %c3_141 = arith.constant 3 : index
    %c0_142 = arith.constant 0 : index
    %c0_143 = arith.constant 0 : index
    %216 = vector.load %arg30[%c3_141, %c0_142, %c0_143] : memref<4x8x8xf32, #tpu.memory_space<vmem>>, vector<1x8x8xf32>
    %217 = vector.shape_cast %216 : vector<1x8x8xf32> to vector<8x8xf32>
    %218 = vector.shape_cast %215 : vector<8x8xf32> to vector<1x8x8xf32>
    tpu.vector_store %arg30[%c3_141, %c0_142, %c0_143], %218 {strides = array<i32>} : memref<4x8x8xf32, #tpu.memory_space<vmem>>, vector<1x8x8xf32>,
    %c0_144 = arith.constant 0 : index
    %c0_145 = arith.constant 0 : index
    %c0_146 = arith.constant 0 : index
    %219 = vector.load %arg26[%c0_144, %c0_145, %c0_146] : memref<4x8x8xf32, #tpu.memory_space<vmem>>, vector<4x8x8xf32>
    %c0_147 = arith.constant 0 : index
    %c0_148 = arith.constant 0 : index
    %c0_149 = arith.constant 0 : index
    %220 = vector.load %arg29[%c0_147, %c0_148, %c0_149] : memref<4x8x8xf32, #tpu.memory_space<vmem>>, vector<4x8x8xf32>
    "tpu.trace_start"() <{level = 10 : i32, message = "htk,hsk->hts"}> : () -> ()
    %cst_150 = arith.constant dense<0.000000e+00> : vector<4x8x8xf32>
    %221 = tpu.matmul %219, %220, %cst_150 {dimension_numbers = #tpu.dot_dimension_numbers<[2], [2], [1], [1], [0, 0, 0, 1, 1, 1], [0], [0]>} : vector<4x8x8xf32>, vector<4x8x8xf32>, vector<4x8x8xf32> -> vector<4x8x8xf32>
    "tpu.trace_stop"() : () -> ()
    %cst_151 = arith.constant 0.353553385 : f32
    %222 = vector.broadcast %cst_151 : f32 to vector<4x8x8xf32>
    %223 = arith.mulf %221, %222 : vector<4x8x8xf32>
    %224 = vector.shape_cast %168 : vector<8x8xf32> to vector<1x8x8xf32>
    %cst_152 = arith.constant 0.000000e+00 : f32
    %225 = vector.broadcast %cst_152 : f32 to vector<1x8x8xf32>
    %226 = arith.cmpf oeq, %224, %225 : vector<1x8x8xf32>
    %cst_153 = arith.constant -1.000000e+09 : f32
    %227 = vector.shape_cast %226 : vector<1x8x8xi1> to vector<1x8x8xi1>
    %228 = vector.broadcast %227 : vector<1x8x8xi1> to vector<4x8x8xi1>
    %229 = vector.broadcast %cst_153 : f32 to vector<4x8x8xf32>
    %230 = arith.select %228, %229, %223 : vector<4x8x8xi1>, vector<4x8x8xf32>
    %cst_154 = arith.constant dense<0xFF800000> : vector<4x8xf32>
    %231 = vector.multi_reduction <maximumf>, %230, %cst_154 [2] : vector<4x8x8xf32> to vector<4x8xf32>
    %232 = vector.shape_cast %231 : vector<4x8xf32> to vector<4x8x1xf32>
    %233 = vector.broadcast %232 : vector<4x8x1xf32> to vector<4x8x8xf32>
    %234 = arith.subf %230, %233 : vector<4x8x8xf32>
    %235 = math.exp %234 : vector<4x8x8xf32>
    %cst_155 = arith.constant dense<0.000000e+00> : vector<4x8xf32>
    %236 = vector.multi_reduction <add>, %235, %cst_155 [2] : vector<4x8x8xf32> to vector<4x8xf32>
    %237 = vector.shape_cast %236 : vector<4x8xf32> to vector<4x8x1xf32>
    %238 = tpu.reciprocal %237 : vector<4x8x1xf32> -> vector<4x8x1xf32>
    %239 = vector.broadcast %238 : vector<4x8x1xf32> to vector<4x8x8xf32>
    %240 = arith.mulf %235, %239 : vector<4x8x8xf32>
    %c0_156 = arith.constant 0 : index
    %c0_157 = arith.constant 0 : index
    %c0_158 = arith.constant 0 : index
    %241 = vector.load %arg30[%c0_156, %c0_157, %c0_158] : memref<4x8x8xf32, #tpu.memory_space<vmem>>, vector<4x8x8xf32>
    "tpu.trace_start"() <{level = 10 : i32, message = "hts,hsk->htk"}> : () -> ()
    %cst_159 = arith.constant dense<0.000000e+00> : vector<4x8x8xf32>
    %242 = tpu.matmul %240, %241, %cst_159 {dimension_numbers = #tpu.dot_dimension_numbers<[2], [1], [1], [2], [0, 0, 0, 1, 1, 2], [0], [0]>} : vector<4x8x8xf32>, vector<4x8x8xf32>, vector<4x8x8xf32> -> vector<4x8x8xf32>
    "tpu.trace_stop"() : () -> ()
    %243 = vector.extract_strided_slice %242 {offsets = [0, 0, 0], sizes = [1, 8, 8], strides = [1, 1, 1]} : vector<4x8x8xf32> to vector<1x8x8xf32>
    %244 = vector.shape_cast %243 : vector<1x8x8xf32> to vector<8x8xf32>
    %c0_160 = arith.constant 0 : index
    %c0_161 = arith.constant 0 : index
    %245 = vector.load %arg31[%c0_160, %c0_161] : memref<8x32xf32, #tpu.memory_space<vmem>>, vector<8x8xf32>
    tpu.vector_store %arg31[%c0_160, %c0_161], %244 {strides = array<i32>} : memref<8x32xf32, #tpu.memory_space<vmem>>, vector<8x8xf32>,
    %246 = vector.extract_strided_slice %242 {offsets = [1, 0, 0], sizes = [1, 8, 8], strides = [1, 1, 1]} : vector<4x8x8xf32> to vector<1x8x8xf32>
    %247 = vector.shape_cast %246 : vector<1x8x8xf32> to vector<8x8xf32>
    %c0_162 = arith.constant 0 : index
    %c8_163 = arith.constant 8 : index
    %248 = vector.load %arg31[%c0_162, %c8_163] : memref<8x32xf32, #tpu.memory_space<vmem>>, vector<8x8xf32>
    tpu.vector_store %arg31[%c0_162, %c8_163], %247 {strides = array<i32>} : memref<8x32xf32, #tpu.memory_space<vmem>>, vector<8x8xf32>,
    %249 = vector.extract_strided_slice %242 {offsets = [2, 0, 0], sizes = [1, 8, 8], strides = [1, 1, 1]} : vector<4x8x8xf32> to vector<1x8x8xf32>
    %250 = vector.shape_cast %249 : vector<1x8x8xf32> to vector<8x8xf32>
    %c0_164 = arith.constant 0 : index
    %c16_165 = arith.constant 16 : index
    %251 = vector.load %arg31[%c0_164, %c16_165] : memref<8x32xf32, #tpu.memory_space<vmem>>, vector<8x8xf32>
    tpu.vector_store %arg31[%c0_164, %c16_165], %250 {strides = array<i32>} : memref<8x32xf32, #tpu.memory_space<vmem>>, vector<8x8xf32>,
    %252 = vector.extract_strided_slice %242 {offsets = [3, 0, 0], sizes = [1, 8, 8], strides = [1, 1, 1]} : vector<4x8x8xf32> to vector<1x8x8xf32>
    %253 = vector.shape_cast %252 : vector<1x8x8xf32> to vector<8x8xf32>
    %c0_166 = arith.constant 0 : index
    %c24_167 = arith.constant 24 : index
    %254 = vector.load %arg31[%c0_166, %c24_167] : memref<8x32xf32, #tpu.memory_space<vmem>>, vector<8x8xf32>
    tpu.vector_store %arg31[%c0_166, %c24_167], %253 {strides = array<i32>} : memref<8x32xf32, #tpu.memory_space<vmem>>, vector<8x8xf32>,
    %c0_168 = arith.constant 0 : index
    %c0_169 = arith.constant 0 : index
    %255 = vector.load %arg31[%c0_168, %c0_169] : memref<8x32xf32, #tpu.memory_space<vmem>>, vector<8x32xf32>
    %cst_170 = arith.constant dense<0.000000e+00> : vector<8x32xf32>
    %256 = tpu.matmul %255, %169, %cst_170 {dimension_numbers = #tpu.dot_dimension_numbers<[1], [0], [0], [1], [0, 0, 1, 1], [], []>} : vector<8x32xf32>, vector<32x32xf32>, vector<8x32xf32> -> vector<8x32xf32>
    %257 = vector.broadcast %170 : vector<1x32xf32> to vector<8x32xf32>
    %258 = arith.addf %256, %257 : vector<8x32xf32>
    %259 = arith.addf %129, %258 : vector<8x32xf32>
    %c0_171 = arith.constant 0 : index
    %c0_172 = arith.constant 0 : index
    %260 = vector.load %arg23[%c0_171, %c0_172] : memref<1x32xf32, #tpu.memory_space<vmem>>, vector<1x32xf32>
    %c0_173 = arith.constant 0 : index
    %c0_174 = arith.constant 0 : index
    %261 = vector.load %arg24[%c0_173, %c0_174] : memref<1x32xf32, #tpu.memory_space<vmem>>, vector<1x32xf32>
    %cst_175 = arith.constant dense<0.000000e+00> : vector<8xf32>
    %262 = vector.multi_reduction <add>, %259, %cst_175 [1] : vector<8x32xf32> to vector<8xf32>
    %263 = vector.shape_cast %262 : vector<8xf32> to vector<8x1xf32>
    %cst_176 = arith.constant 3.200000e+01 : f32
    %264 = vector.broadcast %cst_176 : f32 to vector<8x1xf32>
    %265 = arith.divf %263, %264 : vector<8x1xf32>
    %266 = vector.broadcast %265 : vector<8x1xf32> to vector<8x32xf32>
    %267 = arith.subf %259, %266 : vector<8x32xf32>
    %268 = arith.mulf %267, %267 : vector<8x32xf32>
    %cst_177 = arith.constant dense<0.000000e+00> : vector<8xf32>
    %269 = vector.multi_reduction <add>, %268, %cst_177 [1] : vector<8x32xf32> to vector<8xf32>
    %270 = vector.shape_cast %269 : vector<8xf32> to vector<8x1xf32>
    %cst_178 = arith.constant 3.100000e+01 : f32
    %271 = vector.broadcast %cst_178 : f32 to vector<8x1xf32>
    %272 = arith.divf %270, %271 : vector<8x1xf32>
    %273 = math.sqrt %272 : vector<8x1xf32>
    %cst_179 = arith.constant 9.99999997E-7 : f32
    %274 = vector.broadcast %cst_179 : f32 to vector<8x1xf32>
    %275 = arith.addf %273, %274 : vector<8x1xf32>
    %276 = tpu.reciprocal %275 : vector<8x1xf32> -> vector<8x1xf32>
    %277 = vector.broadcast %265 : vector<8x1xf32> to vector<8x32xf32>
    %278 = arith.subf %259, %277 : vector<8x32xf32>
    %279 = vector.broadcast %260 : vector<1x32xf32> to vector<8x32xf32>
    %280 = arith.mulf %279, %278 : vector<8x32xf32>
    %281 = vector.broadcast %276 : vector<8x1xf32> to vector<8x32xf32>
    %282 = arith.mulf %280, %281 : vector<8x32xf32>
    %283 = vector.broadcast %261 : vector<1x32xf32> to vector<8x32xf32>
    %284 = arith.addf %282, %283 : vector<8x32xf32>
    %c0_180 = arith.constant 0 : index
    %c0_181 = arith.constant 0 : index
    %285 = vector.load %arg15[%c0_180, %c0_181] : memref<32x64xf32, #tpu.memory_space<vmem>>, vector<32x64xf32>
    %cst_182 = arith.constant dense<0.000000e+00> : vector<8x64xf32>
    %286 = tpu.matmul %284, %285, %cst_182 {dimension_numbers = #tpu.dot_dimension_numbers<[1], [0], [0], [1], [0, 0, 1, 1], [], []>} : vector<8x32xf32>, vector<32x64xf32>, vector<8x64xf32> -> vector<8x64xf32>
    %c0_183 = arith.constant 0 : index
    %c0_184 = arith.constant 0 : index
    %287 = vector.load %arg16[%c0_183, %c0_184] : memref<1x64xf32, #tpu.memory_space<vmem>>, vector<1x64xf32>
    %288 = vector.broadcast %287 : vector<1x64xf32> to vector<8x64xf32>
    %289 = arith.addf %286, %288 : vector<8x64xf32>
    %cst_185 = arith.constant 0.000000e+00 : f32
    %290 = vector.broadcast %cst_185 : f32 to vector<8x64xf32>
    %291 = arith.maximumf %289, %290 : vector<8x64xf32>
    %c0_186 = arith.constant 0 : index
    %c0_187 = arith.constant 0 : index
    %292 = vector.load %arg17[%c0_186, %c0_187] : memref<64x32xf32, #tpu.memory_space<vmem>>, vector<64x32xf32>
    %cst_188 = arith.constant dense<0.000000e+00> : vector<8x32xf32>
    %293 = tpu.matmul %291, %292, %cst_188 {dimension_numbers = #tpu.dot_dimension_numbers<[1], [0], [0], [1], [0, 0, 1, 1], [], []>} : vector<8x64xf32>, vector<64x32xf32>, vector<8x32xf32> -> vector<8x32xf32>
    %294 = arith.addf %259, %293 : vector<8x32xf32>
    %c0_189 = arith.constant 0 : index
    %c0_190 = arith.constant 0 : index
    %295 = vector.load %arg18[%c0_189, %c0_190] : memref<1x32xf32, #tpu.memory_space<vmem>>, vector<1x32xf32>
    %296 = vector.broadcast %295 : vector<1x32xf32> to vector<8x32xf32>
    %297 = arith.addf %294, %296 : vector<8x32xf32>
    %c0_191 = arith.constant 0 : index
    %c0_192 = arith.constant 0 : index
    %c0_193 = arith.constant 0 : index
    %298 = vector.load %arg25[%c0_191, %c0_192, %c0_193] : memref<1x8x32xf32, #tpu.memory_space<vmem>>, vector<1x8x32xf32>
    %299 = vector.shape_cast %298 : vector<1x8x32xf32> to vector<8x32xf32>
    %300 = vector.shape_cast %297 : vector<8x32xf32> to vector<1x8x32xf32>
    tpu.vector_store %arg25[%c0_191, %c0_192, %c0_193], %300 {strides = array<i32>} : memref<1x8x32xf32, #tpu.memory_space<vmem>>, vector<1x8x32xf32>,
    return
  }
  func.func @transform_0(%arg0: i32) -> (i32, i32, i32) {
    %c0_i32 = arith.constant 0 : i32
    %c0_i32_0 = arith.constant 0 : i32
    %c0_i32_1 = arith.constant 0 : i32
    return %arg0, %c0_i32, %c0_i32_0 : i32, i32, i32
  }
  func.func @transform_1(%arg0: i32) -> (i32, i32, i32) {
    %c0_i32 = arith.constant 0 : i32
    %c0_i32_0 = arith.constant 0 : i32
    %c0_i32_1 = arith.constant 0 : i32
    return %arg0, %c0_i32, %c0_i32_0 : i32, i32, i32
  }
  func.func @transform_2(%arg0: i32) -> (i32, i32, i32) {
    %c0_i32 = arith.constant 0 : i32
    %c0_i32_0 = arith.constant 0 : i32
    %c0_i32_1 = arith.constant 0 : i32
    return %arg0, %c0_i32, %c0_i32_0 : i32, i32, i32
  }
  func.func @transform_3(%arg0: i32) -> (i32, i32, i32) {
    %c0_i32 = arith.constant 0 : i32
    %c0_i32_0 = arith.constant 0 : i32
    %c0_i32_1 = arith.constant 0 : i32
    return %arg0, %c0_i32, %c0_i32_0 : i32, i32, i32
  }
  func.func @transform_4(%arg0: i32) -> (i32, i32) {
    %c0_i32 = arith.constant 0 : i32
    %c0_i32_0 = arith.constant 0 : i32
    %c0_i32_1 = arith.constant 0 : i32
    return %c0_i32, %c0_i32_0 : i32, i32
  }
  func.func @transform_5(%arg0: i32) -> (i32, i32) {
    %c0_i32 = arith.constant 0 : i32
    %c0_i32_0 = arith.constant 0 : i32
    %c0_i32_1 = arith.constant 0 : i32
    return %c0_i32, %c0_i32_0 : i32, i32
  }
  func.func @transform_6(%arg0: i32) -> (i32, i32) {
    %c0_i32 = arith.constant 0 : i32
    %c0_i32_0 = arith.constant 0 : i32
    %c0_i32_1 = arith.constant 0 : i32
    return %c0_i32, %c0_i32_0 : i32, i32
  }
  func.func @transform_7(%arg0: i32) -> (i32, i32) {
    %c0_i32 = arith.constant 0 : i32
    %c0_i32_0 = arith.constant 0 : i32
    %c0_i32_1 = arith.constant 0 : i32
    return %c0_i32, %c0_i32_0 : i32, i32
  }
  func.func @transform_8(%arg0: i32) -> (i32, i32) {
    %c0_i32 = arith.constant 0 : i32
    %c0_i32_0 = arith.constant 0 : i32
    %c0_i32_1 = arith.constant 0 : i32
    return %c0_i32, %c0_i32_0 : i32, i32
  }
  func.func @transform_9(%arg0: i32) -> (i32, i32) {
    %c0_i32 = arith.constant 0 : i32
    %c0_i32_0 = arith.constant 0 : i32
    %c0_i32_1 = arith.constant 0 : i32
    return %c0_i32, %c0_i32_0 : i32, i32
  }
  func.func @transform_10(%arg0: i32) -> (i32, i32) {
    %c0_i32 = arith.constant 0 : i32
    %c0_i32_0 = arith.constant 0 : i32
    %c0_i32_1 = arith.constant 0 : i32
    return %c0_i32, %c0_i32_0 : i32, i32
  }
  func.func @transform_11(%arg0: i32) -> (i32, i32) {
    %c0_i32 = arith.constant 0 : i32
    %c0_i32_0 = arith.constant 0 : i32
    %c0_i32_1 = arith.constant 0 : i32
    return %c0_i32, %c0_i32_0 : i32, i32
  }
  func.func @transform_12(%arg0: i32) -> (i32, i32) {
    %c0_i32 = arith.constant 0 : i32
    %c0_i32_0 = arith.constant 0 : i32
    %c0_i32_1 = arith.constant 0 : i32
    return %c0_i32, %c0_i32_0 : i32, i32
  }
  func.func @transform_13(%arg0: i32) -> (i32, i32) {
    %c0_i32 = arith.constant 0 : i32
    %c0_i32_0 = arith.constant 0 : i32
    %c0_i32_1 = arith.constant 0 : i32
    return %c0_i32, %c0_i32_0 : i32, i32
  }
  func.func @transform_14(%arg0: i32) -> (i32, i32) {
    %c0_i32 = arith.constant 0 : i32
    %c0_i32_0 = arith.constant 0 : i32
    %c0_i32_1 = arith.constant 0 : i32
    return %c0_i32, %c0_i32_0 : i32, i32
  }
  func.func @transform_15(%arg0: i32) -> (i32, i32) {
    %c0_i32 = arith.constant 0 : i32
    %c0_i32_0 = arith.constant 0 : i32
    %c0_i32_1 = arith.constant 0 : i32
    return %c0_i32, %c0_i32_0 : i32, i32
  }
  func.func @transform_16(%arg0: i32) -> (i32, i32) {
    %c0_i32 = arith.constant 0 : i32
    %c0_i32_0 = arith.constant 0 : i32
    %c0_i32_1 = arith.constant 0 : i32
    return %c0_i32, %c0_i32_0 : i32, i32
  }
  func.func @transform_17(%arg0: i32) -> (i32, i32) {
    %c0_i32 = arith.constant 0 : i32
    %c0_i32_0 = arith.constant 0 : i32
    %c0_i32_1 = arith.constant 0 : i32
    return %c0_i32, %c0_i32_0 : i32, i32
  }
  func.func @transform_18(%arg0: i32) -> (i32, i32) {
    %c0_i32 = arith.constant 0 : i32
    %c0_i32_0 = arith.constant 0 : i32
    %c0_i32_1 = arith.constant 0 : i32
    return %c0_i32, %c0_i32_0 : i32, i32
  }
  func.func @transform_19(%arg0: i32) -> (i32, i32) {
    %c0_i32 = arith.constant 0 : i32
    %c0_i32_0 = arith.constant 0 : i32
    %c0_i32_1 = arith.constant 0 : i32
    return %c0_i32, %c0_i32_0 : i32, i32
  }
  func.func @transform_20(%arg0: i32) -> (i32, i32) {
    %c0_i32 = arith.constant 0 : i32
    %c0_i32_0 = arith.constant 0 : i32
    %c0_i32_1 = arith.constant 0 : i32
    return %c0_i32, %c0_i32_0 : i32, i32
  }
  func.func @transform_21(%arg0: i32) -> (i32, i32) {
    %c0_i32 = arith.constant 0 : i32
    %c0_i32_0 = arith.constant 0 : i32
    %c0_i32_1 = arith.constant 0 : i32
    return %c0_i32, %c0_i32_0 : i32, i32
  }
  func.func @transform_22(%arg0: i32) -> (i32, i32) {
    %c0_i32 = arith.constant 0 : i32
    %c0_i32_0 = arith.constant 0 : i32
    %c0_i32_1 = arith.constant 0 : i32
    return %c0_i32, %c0_i32_0 : i32, i32
  }
  func.func @transform_23(%arg0: i32) -> (i32, i32) {
    %c0_i32 = arith.constant 0 : i32
    %c0_i32_0 = arith.constant 0 : i32
    %c0_i32_1 = arith.constant 0 : i32
    return %c0_i32, %c0_i32_0 : i32, i32
  }
  func.func @transform_24(%arg0: i32) -> (i32, i32, i32) {
    %c0_i32 = arith.constant 0 : i32
    %c0_i32_0 = arith.constant 0 : i32
    %c0_i32_1 = arith.constant 0 : i32
    return %arg0, %c0_i32, %c0_i32_0 : i32, i32, i32
  }
}

</mosaic_0001>

<bundles_post_ra>
// kernel: tpu_custom_call.1
= control target key start
LH: loop header
LB: loop body
LE: loop exit
PB: predicated region body
PF: predicated region fallthrough
CT: control target
= control target key end

     0   :  { %s4922_s0 = inlined_call_operand.hbm [shape: f32[2,8,32], index: 0, kind: input, shape index: {}]   ;;  %s4923_s1 = inlined_call_operand.hbm [shape: f32[2,8,32], index: 1, kind: input, shape index: {}]   ;;  %s4924_s2 = inlined_call_operand.hbm [shape: f32[2,8,8], index: 2, kind: input, shape index: {}]   ;;  %s4925_s3 = inlined_call_operand.hbm [shape: f32[2,8,8], index: 3, kind: input, shape index: {}]   ;;  %s4926_s4 = inlined_call_operand.vmem [shape: f32[32,96], index: 4, kind: input, shape index: {}]   ;;  %s4927_s5 = inlined_call_operand.vmem [shape: f32[1,96], index: 5, kind: input, shape index: {}]   ;;  %s4928_s6 = inlined_call_operand.vmem [shape: f32[32,32], index: 6, kind: input, shape index: {}]   ;;  %s4929_s7 = inlined_call_operand.vmem [shape: f32[1,32], index: 7, kind: input, shape index: {}]   ;;  %s4930_s8 = inlined_call_operand.vmem [shape: f32[32,32], index: 8, kind: input, shape index: {}]   ;;  %s4931_s9 = inlined_call_operand.vmem [shape: f32[1,32], index: 9, kind: input, shape index: {}]   ;;  %s4932_s10 = inlined_call_operand.hbm [shape: f32[32,64], index: 10, kind: input, shape index: {}]   ;;  %s4933_s11 = inlined_call_operand.vmem [shape: f32[1,64], index: 11, kind: input, shape index: {}]   ;;  %s4934_s12 = inlined_call_operand.hbm [shape: f32[32,32], index: 12, kind: input, shape index: {}]   ;;  %s4935_s13 = inlined_call_operand.vmem [shape: f32[1,32], index: 13, kind: input, shape index: {}]   ;;  %s4936_s14 = inlined_call_operand.hbm [shape: f32[32,64], index: 14, kind: input, shape index: {}]   ;;  %s4937_s15 = inlined_call_operand.vmem [shape: f32[1,64], index: 15, kind: input, shape index: {}]   ;;  %s4938_s16 = inlined_call_operand.vmem [shape: f32[64,32], index: 16, kind: input, shape index: {}]   ;;  %s4939_s17 = inlined_call_operand.vmem [shape: f32[1,32], index: 17, kind: input, shape index: {}]   ;;  %s4940_s18 = inlined_call_operand.vmem [shape: f32[1,32], index: 18, kind: input, shape index: {}]   ;;  %s4941_s19 = inlined_call_operand.vmem [shape: f32[1,32], index: 19, kind: input, shape index: {}]   ;;  %s4942_s20 = inlined_call_operand.vmem [shape: f32[1,32], index: 20, kind: input, shape index: {}]   ;;  %s4943_s21 = inlined_call_operand.vmem [shape: f32[1,32], index: 21, kind: input, shape index: {}]   ;;  %s4944_s22 = inlined_call_operand.vmem [shape: f32[1,32], index: 22, kind: input, shape index: {}]   ;;  %s4945_s23 = inlined_call_operand.vmem [shape: f32[1,32], index: 23, kind: input, shape index: {}]   ;;  %s4946_s24 = inlined_call_operand.hbm [shape: f32[2,8,32], index: 24, kind: output, shape index: {}]  }
   0x1   :  { %4983 = sst [smem:[#allocation32_spill]] %s4922_s0 }
   0x2   :  { %4984 = sst [smem:[#allocation33_spill]] %s4923_s1 }
   0x3   :  { %4985 = sst [smem:[#allocation34_spill]] %s4924_s2 }
   0x4   :  { %4986 = sst [smem:[#allocation35_spill]] %s4925_s3 }
   0x5   :  { %4987 = sst [smem:[#allocation36_spill]] %s4926_s4 }
   0x6   :  { %4988 = sst [smem:[#allocation37_spill]] %s4927_s5 }
   0x7   :  { %4989 = sst [smem:[#allocation38_spill]] %s4928_s6 }
   0x8   :  { %4990 = sst [smem:[#allocation39_spill]] %s4929_s7 }
   0x9   :  { %4991 = sst [smem:[#allocation40_spill]] %s4930_s8 }
   0xa   :  { %4992 = sst [smem:[#allocation41_spill]] %s4932_s10 }
   0xb   :  { %4993 = sst [smem:[#allocation42_spill]] %s4934_s12 }
   0xc   :  { %4994 = sst [smem:[#allocation43_spill]] %s4935_s13 }
   0xd   :  { %4995 = sst [smem:[#allocation44_spill]] %s4937_s15 }
   0xe   :  { %4996 = sst [smem:[#allocation45_spill]] %s4938_s16 }
   0xf   :  { %4997 = sst [smem:[#allocation46_spill]] %s4939_s17 }
  0x10   :  { %4998 = sst [smem:[#allocation47_spill]] %s4944_s22 }
  0x11   :  { %4999 = sst [smem:[#allocation48_spill]] %s4945_s23 }
  0x12   :  { %5000 = sst [smem:[#allocation49_spill]] %s4946_s24 }
  0x13   :  { %29 = vsyncpa [#allocation9], 0 }
  0x14   :  { %31 = vsyncpa [#allocation9 + $0x1], 0 }
  0x15   :  { %32 = vsyncpa [#allocation12], 0 }
  0x16   :  { %34 = vsyncpa [#allocation12 + $0x1], 0 }
  0x17   :  { %35 = vsyncpa [#allocation15], 0 }
  0x18   :  { %37 = vsyncpa [#allocation15 + $0x1], 0 }
  0x19   :  { %38 = vsyncpa [#allocation18], 0 }
  0x1a   :  { %39 = vsyncpa [#allocation10], 0 }
  0x1b   :  { %41 = vsyncpa [#allocation10 + $0x1], 0  ;;  %s4215_s5 = smov 0   ;;  %s4217_s26 = smov 0  }
  0x1c   :  { %s4219_s27 = smov 0   ;;  %s4221_s28 = smov 0  }
  0x1d LB: > { %5001 = sst [smem:[#allocation27_spill]] %s4049_s5  ;;  %s4236_s6 = sadd.s32 4294967295, %s4061_s28   ;;  %s4061_s28 = sphi %s4221_s28, %s5062_s28   ;;  %s4057_s27 = sphi %s4219_s27, %s5066_s27   ;;  %s4053_s26 = sphi %s4217_s26, %s5065_s26   ;;  %s4049_s5 = sphi %s4215_s5, %s5064_s5  }
  0x1e   : > { %s3265_s2 = sadd.s32 4294967294, %s4061_s28   ;;  %p67_p0 = scmp.ne.s32.totalorder %s4053_s26, %s4049_s5 }
  0x1f   : > { %p4957_p1 = scmp.eq.s32.totalorder %s4236_s6, 0  ;;  %p595_p3 = scmp.eq.s32.totalorder %s3265_s2, 1 }
  0x20   : > { %p3266_p5 = scmp.ge.s32.totalorder %s4061_s28, 1  ;;  %p602_p7 = scmp.lt.s32.totalorder %s4061_s28, 3 }
  0x21   : > { %p4245_p4 = por %p4957_p1, %p67_p0  ;;  %p4250_p6 = por %p595_p3, %p67_p0 }
  0x22   : > { %p4255_p8 = pnand %p3266_p5, %p602_p7  ;;  %s4063_s30 = smov [#allocation16]  }
  0x23   : > { %s5002_s29 = scalar_select %p4245_p4, 1, 0 }
  0x24   : > { %s5003_s0 = scalar_select %p4250_p6, 1, 0 }
  0x25   : > { %s5005_s7 = scalar_select %p4255_p8, 1, 0 }
  0x26   : > { %5004 = sst [smem:[#allocation28_spill]] %s5003_s0  ;;  %s632_s3 = sshll.u32 %s4063_s30, 4  ;;  %s4259_s3 = int_to_ptr.vmem [resolvable:$true] %s632_s3 }
  0x27   : > { %p3642_p9 = pneg %p4255_p8  ;;  %s4064_s8 = smov [#allocation17]  }
  0x28   : > { %s648_s4 = sshll.u32 %s4064_s8, 4  ;;  %s5007_s10 = sld [smem:[#allocation41_spill]]  ;;  %s4270_s4 = int_to_ptr.vmem [resolvable:$true] %s648_s4 }
  0x29   : > { %p4266_p11 = pnand %p3642_p9, %p4957_p1 }
  0x2b   : > { %s5006_s25 = scalar_select %p4266_p11, 1, 0 }
  0x2c   : > { %p4280_p13 = pneg %p4266_p11 }
  0x2e   : > { %s3775_s0 = scalar_lea.hbm %s5007_s10, 512 }
  0x2f   : > { %p3776_p12 = scmp.ne.s32.totalorder %s5007_s10, %s3775_s0  ;;  %p3782_p5 = scmp.lt.u32.totalorder %s3775_s0, %s5007_s10 }
  0x30   : > { %s5008_s24 = scalar_select %p4280_p13, 1, 0 }
  0x31   : > { %p3778_p0 = pnand %p4280_p13, %p3776_p12 }
  0x33   : > { %p3779_p3 = pneg %p3778_p0 }
  0x35   : > { %p3784_p7 = pnand %p3782_p5, %p3779_p3 }
  0x37   : > { %3787 = shalt.err (!%p3784_p7)
}
  0x38   : > { %s3788_s5 = scalar_lea.vmem %s4259_s3, 512  ;;  %p3796_p2 = scmp.lt.s32.totalorder %s4259_s3, %s4259_s3 }
  0x39   : > { %p3789_p9 = scmp.ne.s32.totalorder %s4259_s3, %s3788_s5  ;;  %p3797_p6 = scmp.lt.s32.totalorder %s3788_s5, %s3788_s5 }
  0x3b   : > { %p3791_p10 = pnand %p3789_p9, %p4280_p13  ;;  %p3798_p12 = por %p3797_p6, %p3796_p2 }
  0x3d   : > { %p3792_p1 = pneg %p3791_p10 }
  0x3f   : > { %p3799_p0 = pnand %p3798_p12, %p3792_p1 }
  0x41   : > { %3802 = shalt.err (!%p3799_p0)
}
  0x42   : > { %s4959_s1 = smov 128   ;;  %s4961_s17 = smov 8  }
  0x43   : > { %3645 = dma.hbm_to_vmem [thread:$0]  (!%p4266_p11), %s5007_s10, 512, %s4259_s3, [#allocation15], %s4959_s1, %s4959_s1, %s4961_s17  }
  0x44   : > { %s5009_s12 = sld [smem:[#allocation42_spill]] }
  0x4a   : > { %s3803_s5 = scalar_lea.hbm %s5009_s12, 512 }
  0x4b   : > { %p3804_p1 = scmp.ne.s32.totalorder %s5009_s12, %s3803_s5  ;;  %p3810_p10 = scmp.lt.u32.totalorder %s3803_s5, %s5009_s12 }
  0x4d   : > { %p3806_p2 = pnand %p3804_p1, %p4280_p13 }
  0x4f   : > { %p3807_p6 = pneg %p3806_p2 }
  0x51   : > { %p3812_p3 = pnand %p3810_p10, %p3807_p6 }
  0x53   : > { %3815 = shalt.err (!%p3812_p3)
}
  0x54   : > { %s3816_s3 = scalar_lea.vmem %s4270_s4, 512  ;;  %p3824_p12 = scmp.lt.s32.totalorder %s4270_s4, %s4270_s4 }
  0x55   : > { %p3817_p5 = scmp.ne.s32.totalorder %s4270_s4, %s3816_s3  ;;  %p3825_p0 = scmp.lt.s32.totalorder %s3816_s3, %s3816_s3 }
  0x57   : > { %p3819_p7 = pnand %p3817_p5, %p4280_p13  ;;  %p3826_p1 = por %p3825_p0, %p3824_p12 }
  0x59   : > { %p3820_p9 = pneg %p3819_p7 }
  0x5b   : > { %p3827_p2 = pnand %p3826_p1, %p3820_p9 }
  0x5d   : > { %3830 = shalt.err (!%p3827_p2)
}
  0x5e   : > { %3648 = dma.hbm_to_vmem [thread:$0]  (!%p4266_p11), %s5009_s12, 512, %s4270_s4, [#allocation18], %s4959_s1, %s4959_s1, %s4961_s17  }
  0x5f   : > { %s4331_s22 = sadd.s32 1, %s4061_s28   ;;  %s54_s23 = sadd.s32 1, %s4057_s27 }
  0x60   : > { %5010 = sst [smem:[#allocation29_spill]] %s4331_s22  ;;  %s51_s0 = ssub.s32 %s4061_s28, %s4331_s22 }
  0x61   : > { %p61_p6 = scmp.ne.s32.totalorder %s4057_s27, %s4053_s26  ;;  %p52_p10 = scmp.eq.s32.totalorder %s51_s0, 0 }
  0x62   : > { %p62_p3 = scmp.eq.s32.totalorder %s4061_s28, 0  ;;  %p5011_p5 = scmp.eq.s32.totalorder %s4236_s6, 1 }
  0x63   : > { %p3672_p9 = scmp.lt.s32.totalorder %s4061_s28, 2  ;;  %s4960_s8 = sand.u32 1, %s4057_s27  }
  0x64   : > { %p4341_p7 = por %p5011_p5, %p61_p6  ;;  %p63_p12 = por %p62_p3, %p61_p6 }
  0x65   : > { %s4347_s30 = scalar_select %p52_p10, %s4057_s27, %s54_s23  }
  0x66   : > { %s5012_s2 = scalar_select %p4341_p7, 1, 0 }
  0x67   : > { %5014 = sst [smem:[#allocation31_spill]] %s4347_s30  ;;  %s4352_s4 = sshll.u32 %s4960_s8, 3 }
  0x68   : > { %5013 = sst [smem:[#allocation30_spill]] %s5012_s2  ;;  %s4355_s5 = sshll.u32 %s4061_s28, 7 }
  0x69   : > { %p4357_p0 = pnand %p3672_p9, %p63_p12  ;;  %s4968_s15 = sand.u32 1, %s4061_s28  }
  0x6a   : > { %s5016_s1 = sld [smem:[#allocation33_spill]]  ;;  %s727_s8 = scalar_lea.vmem [#allocation11], %s4352_s4 }
  0x6b   : > { %s5015_s3 = scalar_select %p4357_p0, 1, 0 }
  0x6c   : > { %s734_s17 = sshll.u32 %s727_s8, 4  ;;  %s4373_s10 = scalar_lea.sflag [#allocation12], %s4968_s15  ;;  %s4369_s17 = int_to_ptr.vmem [resolvable:$true] %s734_s17 }
  0x6d   : > { %p4379_p2 = pneg %p4357_p0 }
  0x70   : > { %s4366_s23 = scalar_lea.hbm %s5016_s1, %s4355_s5  ;;  %s3836_s8 = scalar_lea.hbm %s5016_s1, 256 }
  0x71   : > { %s3831_s12 = scalar_lea.hbm %s4366_s23, 128  ;;  %p3837_p3 = scmp.lt.u32.totalorder %s4366_s23, %s5016_s1 }
  0x72   : > { %p3832_p1 = scmp.ne.s32.totalorder %s4366_s23, %s3831_s12  ;;  %p3838_p5 = scmp.lt.u32.totalorder %s3836_s8, %s3831_s12 }
  0x73   : > { %p3840_p12 = scmp.lt.u32.totalorder %s3831_s12, %s4366_s23 }
  0x74   : > { %p3834_p6 = pnand %p4379_p2, %p3832_p1  ;;  %p3839_p9 = por %p3838_p5, %p3837_p3 }
  0x76   : > { %p3835_p10 = pneg %p3834_p6  ;;  %p3841_p7 = por %p3840_p12, %p3839_p9 }
  0x78   : > { %p3842_p4 = pnand %p3841_p7, %p3835_p10 }
  0x7a   : > { %3845 = shalt.err (!%p3842_p4)
}
  0x7b   : > { %s3846_s15 = scalar_lea.vmem %s4369_s17, 128  ;;  %s4067_s16 = smov [#allocation11]  }
  0x7c   : > { %p3847_p1 = scmp.ne.s32.totalorder %s4369_s17, %s3846_s15  ;;  %s3851_s0 = sshll.u32 %s4067_s16, 4  ;;  %s3852_s0 = int_to_ptr.vmem [resolvable:$false] %s3851_s0 }
  0x7d   : > { %s3853_s22 = scalar_lea.vmem %s3852_s0, 256  ;;  %p3854_p11 = scmp.lt.s32.totalorder %s4369_s17, %s3852_s0 }
  0x7e   : > { %p3849_p6 = pnand %p3847_p1, %p4379_p2  ;;  %p3855_p13 = scmp.lt.s32.totalorder %s3853_s22, %s3846_s15 }
  0x80   : > { %p3850_p8 = pneg %p3849_p6  ;;  %p3856_p3 = por %p3855_p13, %p3854_p11 }
  0x82   : > { %p3857_p5 = pnand %p3856_p3, %p3850_p8 }
  0x84   : > { %3860 = shalt.err (!%p3857_p5)
}
  0x85   : > { %3658 = dma.hbm_to_vmem [thread:$0]  (!%p4357_p0), %s4366_s23, 128, %s4369_s17, %s4373_s10  }
  0x86   : > { %s4068_s12 = smov [#allocation19]   ;;  %s3861_s16 = scalar_lea.hbm %s4936_s14, 512 }
  0x87   : > { %s664_s2 = sshll.u32 %s4068_s12, 4  ;;  %p3862_p4 = scmp.ne.s32.totalorder %s4936_s14, %s3861_s16  ;;  %s665_s2 = int_to_ptr.vmem [resolvable:$true] %s664_s2 }
  0x88   : > { %p5018_p8 = scmp.ne.s32.totalorder %s5008_s24, 0  ;;  %p3868_p7 = scmp.lt.u32.totalorder %s3861_s16, %s4936_s14 }
  0x8a   : > { %p3864_p11 = pnand %p3862_p4, %p5018_p8 }
  0x8c   : > { %p3865_p13 = pneg %p3864_p11 }
  0x8e   : > { %p3870_p10 = pnand %p3868_p7, %p3865_p13 }
  0x90   : > { %3873 = shalt.err (!%p3870_p10)
}
  0x91   : > { %s3874_s17 = scalar_lea.vmem %s665_s2, 512  ;;  %p3882_p6 = scmp.lt.s32.totalorder %s665_s2, %s665_s2 }
  0x92   : > { %p3875_p9 = scmp.ne.s32.totalorder %s665_s2, %s3874_s17  ;;  %p3883_p3 = scmp.lt.s32.totalorder %s3874_s17, %s3874_s17 }
  0x94   : > { %p3877_p12 = pnand %p3875_p9, %p5018_p8  ;;  %p3884_p5 = por %p3883_p3, %p3882_p6 }
  0x96   : > { %p3878_p1 = pneg %p3877_p12 }
  0x98   : > { %p3885_p0 = pnand %p3884_p5, %p3878_p1 }
  0x9a   : > { %3888 = shalt.err (!%p3885_p0)
}
  0x9b   : > { %p5019_p4 = scmp.ne.s32.totalorder %s5006_s25, 0  ;;  %s5020_s13 = smov 8  }
  0x9c   : > { %s5021_s1 = smov 128   ;;  %s5022_s16 = sld [smem:[#allocation32_spill]] }
  0x9d   : > { %3651 = dma.hbm_to_vmem [thread:$0]  (!%p5019_p4), %s4936_s14, 512, %s665_s2, [#allocation18], %s5021_s1, %s5021_s1, %s5020_s13  }
  0x9e   : > { %s709_s25 = scalar_lea.vmem [#allocation8], %s4352_s4  ;;  %s5023_s22 = sand.u32 1, %s4057_s27  }
  0x9f   : > { %s716_s15 = sshll.u32 %s709_s25, 4  ;;  %s706_s17 = scalar_lea.sflag [#allocation9], %s5023_s22  ;;  %s717_s15 = int_to_ptr.vmem [resolvable:$true] %s716_s15 }
  0xa2   : > { %s4428_s0 = scalar_lea.hbm %s5022_s16, %s4355_s5  ;;  %s3894_s1 = scalar_lea.hbm %s5022_s16, 256 }
  0xa3   : > { %s3889_s23 = scalar_lea.hbm %s4428_s0, 128  ;;  %p3895_p13 = scmp.lt.u32.totalorder %s4428_s0, %s5022_s16 }
  0xa4   : > { %p3890_p0 = scmp.ne.s32.totalorder %s4428_s0, %s3889_s23  ;;  %p3896_p7 = scmp.lt.u32.totalorder %s3894_s1, %s3889_s23 }
  0xa5   : > { %p3898_p9 = scmp.lt.u32.totalorder %s3889_s23, %s4428_s0 }
  0xa6   : > { %p3892_p8 = pnand %p3890_p0, %p4379_p2  ;;  %p3897_p10 = por %p3896_p7, %p3895_p13 }
  0xa8   : > { %p3893_p11 = pneg %p3892_p8  ;;  %p3899_p12 = por %p3898_p9, %p3897_p10 }
  0xaa   : > { %p3900_p1 = pnand %p3899_p12, %p3893_p11 }
  0xac   : > { %3903 = shalt.err (!%p3900_p1)
}
  0xad   : > { %s3904_s8 = scalar_lea.vmem %s717_s15, 128  ;;  %s4069_s25 = smov [#allocation8]  }
  0xae   : > { %p3905_p6 = scmp.ne.s32.totalorder %s717_s15, %s3904_s8  ;;  %s3909_s22 = sshll.u32 %s4069_s25, 4  ;;  %s3910_s22 = int_to_ptr.vmem [resolvable:$false] %s3909_s22 }
  0xaf   : > { %s3911_s2 = scalar_lea.vmem %s3910_s22, 256  ;;  %p3912_p4 = scmp.lt.s32.totalorder %s717_s15, %s3910_s22 }
  0xb0   : > { %p3907_p3 = pnand %p3905_p6, %p4379_p2  ;;  %p3913_p0 = scmp.lt.s32.totalorder %s3911_s2, %s3904_s8 }
  0xb2   : > { %p3908_p5 = pneg %p3907_p3  ;;  %p3914_p8 = por %p3913_p0, %p3912_p4 }
  0xb4   : > { %p3915_p7 = pnand %p3914_p8, %p3908_p5 }
  0xb6   : > { %3918 = shalt.err (!%p3915_p7)
}
  0xb7   : > { %p5024_p13 = scmp.ne.s32.totalorder %s5015_s3, 0  ;;  %s5025_s1 = sld [smem:[#allocation34_spill]] }
  0xb8   : > { %s745_s24 = scalar_lea.vmem [#allocation13], %s4352_s4 }
  0xb9   : > { %3655 = dma.hbm_to_vmem [thread:$0]  (!%p5024_p13), %s4428_s0, 128, %s717_s15, %s706_s17  }
  0xba   : > { %s752_s8 = sshll.u32 %s745_s24, 4  ;;  %s753_s8 = int_to_ptr.vmem [resolvable:$true] %s752_s8 }
  0xbd   : > { %s4454_s12 = scalar_lea.hbm %s5025_s1, %s4355_s5  ;;  %s3924_s0 = scalar_lea.hbm %s5025_s1, 256 }
  0xbe   : > { %s3919_s25 = scalar_lea.hbm %s4454_s12, 128  ;;  %p3925_p12 = scmp.lt.u32.totalorder %s4454_s12, %s5025_s1 }
  0xbf   : > { %p3920_p11 = scmp.ne.s32.totalorder %s4454_s12, %s3919_s25  ;;  %p3926_p1 = scmp.lt.u32.totalorder %s3924_s0, %s3919_s25 }
  0xc0   : > { %p3928_p3 = scmp.lt.u32.totalorder %s3919_s25, %s4454_s12 }
  0xc1   : > { %p3922_p10 = pnand %p3920_p11, %p4379_p2  ;;  %p3927_p6 = por %p3926_p1, %p3925_p12 }
  0xc3   : > { %p3923_p9 = pneg %p3922_p10  ;;  %p3929_p5 = por %p3928_p3, %p3927_p6 }
  0xc5   : > { %p3930_p4 = pnand %p3929_p5, %p3923_p9 }
  0xc7   : > { %3933 = shalt.err (!%p3930_p4)
}
  0xc8   : > { %s3934_s23 = scalar_lea.vmem %s753_s8, 128  ;;  %s4070_s13 = smov [#allocation13]  }
  0xc9   : > { %p3935_p0 = scmp.ne.s32.totalorder %s753_s8, %s3934_s23  ;;  %s3939_s24 = sshll.u32 %s4070_s13, 4  ;;  %s3940_s24 = int_to_ptr.vmem [resolvable:$false] %s3939_s24 }
  0xca   : > { %s3941_s22 = scalar_lea.vmem %s3940_s24, 256  ;;  %p3942_p11 = scmp.lt.s32.totalorder %s753_s8, %s3940_s24 }
  0xcb   : > { %p3937_p8 = pnand %p3935_p0, %p4379_p2  ;;  %p3943_p10 = scmp.lt.s32.totalorder %s3941_s22, %s3934_s23 }
  0xcd   : > { %p3938_p7 = pneg %p3937_p8  ;;  %p3944_p13 = por %p3943_p10, %p3942_p11 }
  0xcf   : > { %p3945_p1 = pnand %p3944_p13, %p3938_p7 }
  0xd1   : > { %3948 = shalt.err (!%p3945_p1)
}
  0xd2   : > { %p5026_p12 = scmp.ne.s32.totalorder %s5015_s3, 0  ;;  %s5027_s0 = sld [smem:[#allocation35_spill]] }
  0xd3   : > { %s763_s17 = scalar_lea.vmem [#allocation14], %s4352_s4  ;;  %s5028_s13 = sand.u32 1, %s4061_s28  }
  0xd4   : > { %3661 = dma.hbm_to_vmem [thread:$0]  (!%p5026_p12), %s4454_s12, 128, %s753_s8, %s4373_s10  }
  0xd5   : > { %s770_s23 = sshll.u32 %s763_s17, 4  ;;  %s760_s24 = scalar_lea.sflag [#allocation15], %s5028_s13  ;;  %s771_s23 = int_to_ptr.vmem [resolvable:$true] %s770_s23 }
  0xd8   : > { %s4479_s15 = scalar_lea.hbm %s5027_s0, %s4355_s5  ;;  %s3954_s8 = scalar_lea.hbm %s5027_s0, 256 }
  0xd9   : > { %s3949_s22 = scalar_lea.hbm %s4479_s15, 128  ;;  %p3955_p3 = scmp.lt.u32.totalorder %s4479_s15, %s5027_s0 }
  0xda   : > { %p3950_p13 = scmp.ne.s32.totalorder %s4479_s15, %s3949_s22  ;;  %p3956_p5 = scmp.lt.u32.totalorder %s3954_s8, %s3949_s22 }
  0xdb   : > { %p3958_p0 = scmp.lt.u32.totalorder %s3949_s22, %s4479_s15 }
  0xdc   : > { %p3952_p9 = pnand %p3950_p13, %p4379_p2  ;;  %p3957_p4 = por %p3956_p5, %p3955_p3 }
  0xde   : > { %p3953_p6 = pneg %p3952_p9  ;;  %p3959_p8 = por %p3958_p0, %p3957_p4 }
  0xe0   : > { %p3960_p7 = pnand %p3959_p8, %p3953_p6 }
  0xe2   : > { %3963 = shalt.err (!%p3960_p7)
}
  0xe3   : > { %s3964_s4 = scalar_lea.vmem %s771_s23, 128  ;;  %s4071_s2 = smov [#allocation14]  }
  0xe4   : > { %p3965_p11 = scmp.ne.s32.totalorder %s771_s23, %s3964_s4  ;;  %s3969_s17 = sshll.u32 %s4071_s2, 4  ;;  %s3970_s17 = int_to_ptr.vmem [resolvable:$false] %s3969_s17 }
  0xe5   : > { %s3971_s13 = scalar_lea.vmem %s3970_s17, 256  ;;  %p3972_p13 = scmp.lt.s32.totalorder %s771_s23, %s3970_s17 }
  0xe6   : > { %p3967_p10 = pnand %p3965_p11, %p4379_p2  ;;  %p3973_p9 = scmp.lt.s32.totalorder %s3971_s13, %s3964_s4 }
  0xe8   : > { %p3968_p1 = pneg %p3967_p10  ;;  %p3974_p12 = por %p3973_p9, %p3972_p13 }
  0xea   : > { %p3975_p3 = pnand %p3974_p12, %p3968_p1 }
  0xec   : > { %3978 = shalt.err (!%p3975_p3)
}
  0xed   : > { %p5029_p5 = scmp.ne.s32.totalorder %s5015_s3, 0  ;;  %p5030_p6 = scmp.ne.s32.totalorder %s5005_s7, 0 }
  0xee   : > { %s4504_s30 = sand.u32 (!%p5030_p6), 1, %s4053_s26   ;;  %p5031_p2 = scmp.ne.s32.totalorder (!%p5030_p6), %s5002_s29, 0 }
  0xef   : > { %3664 = dma.hbm_to_vmem [thread:$0]  (!%p5029_p5), %s4479_s15, 128, %s771_s23, %s760_s24  }
  0xf0   : > { %779 = sbr.rel (%p5030_p6) target bundleno = 4549 (0x11c5), region = 116  ;;  %s4507_s22 = sshll.u32 (!%p5030_p6), %s4504_s30, 3 }
  0xf1   : > { %s782_s10 = scalar_lea.sflag (!%p5030_p6), [#allocation9], %s4504_s30  ;;  %s785_s12 = scalar_lea.vmem (!%p5030_p6), [#allocation8], %s4507_s22 }
  0xf7   : > { %4024 = dma.done.wait (%p5031_p2), %s782_s10, 128  }
  0xf8   : > { %4026 = vsyncadd (%p5031_p2), %s782_s10, 4294967168  ;;  %s790_s7 = sand.u32 1, %s4236_s6   ;;  %s794_s15 = scalar_lea.vmem [#allocation11], %s4507_s22 }
  0xf9   : > { %s791_s3 = scalar_lea.sflag [#allocation12], %s790_s7 }
  0xfa   : > { %4028 = dma.done.wait (%p5031_p2), %s791_s3, 256  }
  0xfb   : > { %4030 = vsyncadd (%p5031_p2), %s791_s3, 4294967040  ;;  %s803_s23 = scalar_lea.vmem [#allocation13], %s4507_s22  ;;  %s809_s24 = scalar_lea.sflag [#allocation15], %s790_s7 }
  0xfc   : > { %4032 = dma.done.wait (%p5031_p2), %s809_s24, 128  }
  0xfd   : > { %4034 = vsyncadd (%p5031_p2), %s809_s24, 4294967168  ;;  %p5032_p12 = scmp.eq.s32.totalorder %s4236_s6, 0 }
  0xff   : > { %4036 = dma.done.wait (%p5032_p12), [#allocation15], 512   ;;  %p5033_p4 = pmov %p5032_p12 }
 0x101   : > { %4038 = vsyncadd (%p5033_p4), [#allocation15], 4294966784  ;;  %p5034_p0 = pmov %p5033_p4 }
 0x103   : > { %4040 = dma.done.wait (%p5034_p0), [#allocation18], 1024   ;;  %p5035_p8 = pmov %p5034_p0 }
 0x104   : > { %vm908_vm0 = vcmask 261120   ;;  %v4535_v0 = vld [vmem:[%s785_s12] sm:$0xff]  ;;  %s5036_s25 = sld [smem:[#allocation36_spill]]  ;;  %v4072_v10 = vmov 0.0|0.0   ;;  %vm4073_vm1 = vmmov 0   ;;  %v4074_v13 = vmov 0.0  }
 0x105   : > { %4042 = vsyncadd (%p5035_p8), [#allocation18], 4294966272  ;;  %v909_v1 = vsel %vm908_vm0, %v4535_v0, 0.0  ;;  %3572 = vmatprep.subr.bf16.mxu1 %v4072_v10  ;;  %3415 = vmatprep.mubr.msk.f32.mxu1 %vm4073_vm1, %v4074_v13  ;;  %v3288_v23 = vld [vmem:[%s4940_s18] ss:$0 sm:$0xff]  ;;  %s5037_s2 = sld [smem:[#allocation37_spill]] }
 0x106   : > { %910 = vadd.xlane.f32.xlu0 %v909_v1  ;;  %3428 = vmatprep.subr.mxu0 %v4074_v13  ;;  %v3289_v26 = vld [vmem:[%s4941_s19] ss:$0 sm:$0xff]  ;;  %vm1035_vm4 = vcmask 64512   ;;  %s4075_s17 = smov 120   ;;  %s4978_s13 = smov 96   ;;  %v1029_v48 = vld [vmem:[%s803_s23] sm:$0xff] }
 0x107   : > { %3430 = vmatprep.mubr.msk.f32.mxu0 %vm4073_vm1, %v4074_v13  ;;  %s4979_s10 = smov 88   ;;  %s4977_s12 = smov 80   ;;  %vm1407_vm5 = vcmp.eq.f32.partialorder %v1029_v48, 0.0  ;;  %vm1759_vm6 = vcmask 130112   ;;  %vm1765_vm7 = vcmask 195712   ;;  %vm1771_vm8 = vcmask 261312  }
 0x108   : > { %s4976_s7 = smov 72   ;;  %s4080_s3 = smov 112   ;;  %vm3003_vm14 = vcmask 523264  }
 0x109   : > { %s4081_s24 = smov 104   ;;  %s4082_s23 = smov 64  }
 0x10a   : > { %v945_v7 = vld [vmem:[%s5036_s25] sm:$0xff]  ;;  %v946_v8 = vld [vmem:[%s5036_s25 + $0x8] sm:$0xff]  ;;  %v947_v9 = vld [vmem:[%s5036_s25 + $0x10] sm:$0xff]  ;;  %s4083_s29 = smov 48   ;;  %s4084_s5 = smov 40  }
 0x10b   : > { %v3573_v11 = vpack.c.bf16 %v946_v8, %v945_v7  ;;  %v948_v12 = vld [vmem:[%s5036_s25 + $0x18] sm:$0xff]  ;;  %v3290_v29 = vld [vmem:[%s5037_s2] ss:$0 sm:$0xff]  ;;  %s4085_s4 = smov 56   ;;  %s4981_s2 = smov 16  }
 0x10c   : > { %v3576_v14 = vpack.c.bf16 %v948_v12, %v947_v9  ;;  %s5046_s8 = smov 8  }
 0x10d   : > { %3574 = vmatpush3.bf16.msra.mxu1 %v3573_v11 }
 0x10e   : > { %3575 = vmatprep.subr.bf16.mxu1 %v4072_v10 }
 0x111   : > { %3577 = vmatpush3.bf16.msra.mxu1 %v3576_v14 }
 0x112   : > { %3418 = vmatprep.subr.mxu1 %v4074_v13 }
 0x193   : > { %v911_v2 = vpop.xlane.xlu0 %910 }
 0x194   : > { %v913_v3 = vmul.f32 0.03125, %v911_v2 }
 0x196   : > { %v914_v4 = vsub.f32 %v4535_v0, %v913_v3 }
 0x198   : > { %v915_v5 = vmul.f32 %v914_v4, %v914_v4  ;;  %v936_v24 = vmul.f32 %v3288_v23, %v914_v4 }
 0x19a   : > { %v916_v6 = vsel %vm908_vm0, %v915_v5, 0.0 }
 0x19b   : > { %917 = vadd.xlane.f32.xlu0 %v916_v6 }
 0x228   : > { %v918_v15 = vpop.xlane.xlu0 %917 }
 0x229   : > { %v920_v16 = vmul.f32 0.032258064, %v918_v15 }
 0x22b   : > { %3731 = vrsqrt.f32 %v920_v16  ;;  %vm923_vm2 = vcmp.eq.f32.partialorder %v920_v16, inf  ;;  %v926_v19 = vand.u32 2147483648, %v920_v16  ;;  %vm925_vm3 = vcmp.eq.f32.partialorder %v920_v16, 0.0 }
 0x235   : > { %v3732_v17 = vpop.eup %3731 }
 0x236   : > { %v922_v18 = vmul.f32 %v3732_v17, %v920_v16 }
 0x238   : > { %v924_v20 = vsel %vm923_vm2, %v920_v16, %v922_v18 }
 0x239   : > { %v927_v21 = vsel %vm925_vm3, %v926_v19, %v924_v20 }
 0x23a   : > { %v928_v22 = vadd.f32 1e-06, %v927_v21 }
 0x23c   : > { %3733 = vrcp.f32 %v928_v22 }
 0x246   : > { %v3734_v25 = vpop.eup %3733 }
 0x247   : > { %v937_v27 = vmul.f32 %v3734_v25, %v936_v24 }
 0x249   : > { %v944_v28 = vadd.f32 %v3289_v26, %v937_v27 }
 0x24b   : > { %3416 = vmatmul.mubr.msk.f32.vlgmr.msra.gmra.mrb[0].mxu1 %vm908_vm0, %v944_v28 }
 0x24c   : > { %3420 = vmatprep.mubr.msk.f32.mxu1 %vm4073_vm1, %v4074_v13 }
 0x31e   : > { %v1025_v30 = vpop.f32.mrb[0].mxu1 }
 0x31f   : > { %v4573_v31 = vadd.f32 %v3290_v29, %v1025_v30  ;;  %v3417_v32 = vpop.f32.mrb[1].mxu1 }
 0x321   : > { %1046 = vrot.lane.b32.xlu0 %v4573_v31, %s4075_s17  ;;  %1038 = vrot.lane.b32.xlu1 %v4573_v31, %s4978_s13  ;;  %1036 = vst.msk [vmem:[#allocation2] sm:$0xff] %vm1035_vm4, %v4573_v31  ;;  %s4980_s13 = smov 24  }
 0x325   : > { %1051 = vrot.lane.b32.xlu1 %v4573_v31, %s4979_s10  ;;  %s5040_s10 = sld [smem:[#allocation40_spill]] }
 0x328   : > { %v1091_v38 = vld [vmem:[#allocation2] sm:$0xff] }
 0x329   : > { %1066 = vrot.lane.b32.xlu1 %v4573_v31, %s4977_s12 }
 0x32d   : > { %1081 = vrot.lane.b32.xlu1 %v4573_v31, %s4976_s7  ;;  %s5039_s7 = sld [smem:[#allocation39_spill]] }
 0x331   : > { %1061 = vrot.lane.b32.xlu1 %v4573_v31, %s4080_s3 }
 0x335   : > { %1076 = vrot.lane.b32.xlu1 %v4573_v31, %s4081_s24 }
 0x393   : > { %v1047_v33 = vpop.permute.xlu0 %1046  ;;  %v1039_v34 = vpop.permute.xlu1 %1038 }
 0x394   : > { %1050 = vst.msk [vmem:[#allocation2 + $0x8] sm:$0xff] %vm1035_vm4, %v1047_v33  ;;  %1041 = vst.msk [vmem:[#allocation3] sm:$0xff] %vm1035_vm4, %v1039_v34 }
 0x397   : > { %v1052_v35 = vpop.permute.xlu1 %1051 }
 0x398   : > { %1055 = vst.msk [vmem:[#allocation3 + $0x8] sm:$0xff] %vm1035_vm4, %v1052_v35 }
 0x39b   : > { %v1067_v36 = vpop.permute.xlu1 %1066  ;;  %v1095_v37 = vld [vmem:[#allocation3] sm:$0xff]  ;;  %v1092_v41 = vld [vmem:[#allocation2 + $0x8] sm:$0xff] }
 0x39c   : > { %1070 = vst.msk [vmem:[#allocation3 + $0x10] sm:$0xff] %vm1035_vm4, %v1067_v36  ;;  %3419 = vmatpush3.xpose.msk.msra.mxu1 %vm1035_vm4, %v1095_v37 }
 0x39d   : > { %3423 = vmatprep.subr.mxu1 %v4074_v13 }
 0x39f   : > { %v1082_v39 = vpop.permute.xlu1 %1081  ;;  %3421 = vmatmul.mubr.msk.f32.vlgmr.msra.gmra.mrb[2].mxu1 %vm1035_vm4, %v1091_v38  ;;  %v1096_v40 = vld [vmem:[#allocation3 + $0x8] sm:$0xff] }
 0x3a0   : > { %1085 = vst.msk [vmem:[#allocation3 + $0x18] sm:$0xff] %vm1035_vm4, %v1082_v39  ;;  %3424 = vmatpush3.xpose.msk.msra.mxu1 %vm1035_vm4, %v1096_v40  ;;  %3425 = vmatprep.mubr.msk.f32.mxu1 %vm4073_vm1, %v4074_v13 }
 0x3a1   : > { %3433 = vmatprep.subr.mxu1 %v4074_v13 }
 0x3a3   : > { %v1062_v42 = vpop.permute.xlu1 %1061  ;;  %3426 = vmatmul.mubr.msk.f32.vlgmr.msra.gmra.mrb[4].mxu1 %vm1035_vm4, %v1092_v41  ;;  %v1097_v43 = vld [vmem:[#allocation3 + $0x10] sm:$0xff] }
 0x3a4   : > { %1065 = vst.msk [vmem:[#allocation2 + $0x10] sm:$0xff] %vm1035_vm4, %v1062_v42  ;;  %3429 = vmatpush3.xpose.msk.msra.mxu0 %vm1035_vm4, %v1097_v43  ;;  %3435 = vmatprep.mubr.msk.f32.mxu1 %vm4073_vm1, %v4074_v13 }
 0x3a5   : > { %3438 = vmatprep.subr.mxu0 %v4074_v13 }
 0x3a7   : > { %v1077_v44 = vpop.permute.xlu1 %1076  ;;  %v1098_v45 = vld [vmem:[#allocation3 + $0x18] sm:$0xff] }
 0x3a8   : > { %1080 = vst.msk [vmem:[#allocation2 + $0x18] sm:$0xff] %vm1035_vm4, %v1077_v44  ;;  %3434 = vmatpush3.xpose.msk.msra.mxu1 %vm1035_vm4, %v1098_v45 }
 0x3a9   : > { %3443 = vmatprep.subr.mxu1 %v4074_v13 }
 0x3ab   : > { %v1093_v46 = vld [vmem:[#allocation2 + $0x10] sm:$0xff] }
 0x3ac   : > { %3431 = vmatmul.mubr.msk.f32.vlgmr.msra.gmra.mrb[0].mxu0 %vm1035_vm4, %v1093_v46 }
 0x3ad   : > { %3440 = vmatprep.mubr.msk.f32.mxu0 %vm4073_vm1, %v4074_v13 }
 0x3af   : > { %v1094_v47 = vld [vmem:[#allocation2 + $0x18] sm:$0xff] }
 0x3b0   : > { %3436 = vmatmul.mubr.msk.f32.vlgmr.msra.gmra.mrb[6].mxu1 %vm1035_vm4, %v1094_v47 }
 0x3b1   : > { %3445 = vmatprep.mubr.msk.f32.mxu1 %vm4073_vm1, %v4074_v13 }
 0x472   : > { %v1171_v49 = vpop.f32.mrb[2].mxu1 }
 0x473   : > { %v1403_v50 = vmul.f32 0.35355338, %v1171_v49  ;;  %v3422_v51 = vpop.f32.mrb[3].mxu1 }
 0x475   : > { %v1410_v52 = vsel %vm1407_vm5, -1e+09, %v1403_v50 }
 0x476   : > { %v1247_v53 = vpop.f32.mrb[4].mxu1  ;;  %v1414_v54 = vsel %vm1035_vm4, %v1410_v52, -inf }
 0x477   : > { %v1404_v55 = vmul.f32 0.35355338, %v1247_v53  ;;  %1415 = vmax.xlane.f32.xlu1 %v1414_v54  ;;  %v3427_v56 = vpop.f32.mrb[5].mxu1 }
 0x479   : > { %v1411_v57 = vsel %vm1407_vm5, -1e+09, %v1404_v55 }
 0x47a   : > { %v1417_v58 = vsel %vm1035_vm4, %v1411_v57, -inf }
 0x47b   : > { %1418 = vmax.xlane.f32.xlu0 %v1417_v58 }
 0x47f   : > { %v1323_v59 = vpop.f32.mrb[0].mxu0 }
 0x480   : > { %v1405_v60 = vmul.f32 0.35355338, %v1323_v59  ;;  %v3432_v61 = vpop.f32.mrb[1].mxu0 }
 0x482   : > { %v1412_v62 = vsel %vm1407_vm5, -1e+09, %v1405_v60 }
 0x483   : > { %v1399_v63 = vpop.f32.mrb[6].mxu1  ;;  %v1420_v1 = vsel %vm1035_vm4, %v1412_v62, -inf }
 0x484   : > { %v1406_v2 = vmul.f32 0.35355338, %v1399_v63  ;;  %1421 = vmax.xlane.f32.xlu1 %v1420_v1  ;;  %v3437_v3 = vpop.f32.mrb[7].mxu1 }
 0x485   : > { %v3304_v3 = vld [vmem:[%s5039_s7] ss:$0 sm:$0xff]  ;;  %s5044_s7 = smov 80  }
 0x486   : > { %v1413_v4 = vsel %vm1407_vm5, -1e+09, %v1406_v2 }
 0x487   : > { %v1423_v5 = vsel %vm1035_vm4, %v1413_v4, -inf }
 0x488   : > { %1424 = vmax.xlane.f32.xlu0 %v1423_v5 }
 0x495   : > { %1042 = vrot.lane.b32.xlu1 %v4573_v31, %s4082_s23  ;;  %s4982_s23 = smov 8  }
 0x504   : > { %v1416_v6 = vpop.xlane.xlu1 %1415 }
 0x505   : > { %v1426_v7 = vsub.f32 %v1410_v52, %v1416_v6 }
 0x507   : > { %v1430_v8 = vmul.f32 1.442695, %v1426_v7 }
 0x508   : > { %v1419_v9 = vpop.xlane.xlu0 %1418 }
 0x509   : > { %3735 = vpow2.f32 %v1430_v8  ;;  %v1427_v11 = vsub.f32 %v1411_v57, %v1419_v9 }
 0x50b   : > { %v1432_v12 = vmul.f32 1.442695, %v1427_v11 }
 0x50d   : > { %3737 = vpow2.f32 %v1432_v12 }
 0x511   : > { %v1422_v14 = vpop.xlane.xlu1 %1421 }
 0x512   : > { %v1428_v15 = vsub.f32 %v1412_v62, %v1422_v14 }
 0x513   : > { %v3736_v16 = vpop.eup %3735 }
 0x514   : > { %v1434_v17 = vmul.f32 1.442695, %v1428_v15  ;;  %v1438_v18 = vsel %vm1035_vm4, %v3736_v16, 0.0 }
 0x515   : > { %1439 = vadd.xlane.f32.xlu1 %v1438_v18  ;;  %v1043_v19 = vpop.permute.xlu1 %1042  ;;  %v1425_v20 = vpop.xlane.xlu0 %1424 }
 0x516   : > { %3739 = vpow2.f32 %v1434_v17  ;;  %1045 = vst.msk [vmem:[#allocation4] sm:$0xff] %vm1035_vm4, %v1043_v19  ;;  %v1429_v21 = vsub.f32 %v1413_v4, %v1425_v20  ;;  %v1975_v17 = vld [vmem:[#allocation16 + $0x8] sm:$0xff]  ;;  %v1976_v19 = vld [vmem:[#allocation16 + $0x10] sm:$0xff] }
 0x517   : > { %v3738_v22 = vpop.eup %3737 }
 0x518   : > { %v1436_v23 = vmul.f32 1.442695, %v1429_v21  ;;  %v1441_v24 = vsel %vm1035_vm4, %v3738_v22, 0.0  ;;  %v1890_v21 = vld [vmem:[%s5040_s10] sm:$0xff] }
 0x519   : > { %1442 = vadd.xlane.f32.xlu0 %v1441_v24 }
 0x51a   : > { %3741 = vpow2.f32 %v1436_v23  ;;  %v1892_v23 = vld [vmem:[%s5040_s10 + $0x10] sm:$0xff] }
 0x51d   : > { %v1458_v25 = vld [vmem:[#allocation4] sm:$0xff] }
 0x51e   : > { %3439 = vmatpush3.msra.mxu0 %v1458_v25  ;;  %v1893_v25 = vld [vmem:[%s5040_s10 + $0x18] sm:$0xff] }
 0x51f   : > { %3448 = vmatprep.subr.mxu0 %v4074_v13 }
 0x520   : > { %v3740_v26 = vpop.eup %3739 }
 0x521   : > { %v1444_v27 = vsel %vm1035_vm4, %v3740_v26, 0.0 }
 0x522   : > { %1445 = vadd.xlane.f32.xlu1 %v1444_v27  ;;  %v3588_v27 = vpack.c.bf16 %v1893_v25, %v1892_v23 }
 0x524   : > { %v3742_v28 = vpop.eup %3741 }
 0x525   : > { %v1447_v29 = vsel %vm1035_vm4, %v3742_v28, 0.0 }
 0x526   : > { %1448 = vadd.xlane.f32.xlu0 %v1447_v29 }
 0x533   : > { %1071 = vrot.lane.b32.xlu1 %v4573_v31, %s4083_s29  ;;  %s5038_s29 = sld [smem:[#allocation38_spill]] }
 0x537   : > { %1086 = vrot.lane.b32.xlu1 %v4573_v31, %s4084_s5 }
 0x539   : > { %v1030_v50 = vld [vmem:[%s5038_s29] sm:$0xff]  ;;  %v1031_v51 = vld [vmem:[%s5038_s29 + $0x8] sm:$0xff]  ;;  %v1032_v53 = vld [vmem:[%s5038_s29 + $0x10] sm:$0xff] }
 0x53a   : > { %v3579_v52 = vpack.c.bf16 %v1031_v51, %v1030_v50  ;;  %v1033_v54 = vld [vmem:[%s5038_s29 + $0x18] sm:$0xff]  ;;  %v3308_v51 = vld [vmem:[%s4931_s9] ss:$0 sm:$0xff] }
 0x53b   : > { %v3582_v55 = vpack.c.bf16 %v1033_v54, %v1032_v53 }
 0x53c   : > { %1056 = vrot.lane.b32.xlu0 %v4573_v31, %s4085_s4  ;;  %s5049_s4 = sld [smem:[#allocation43_spill]] }
 0x5a2   : > { %v1440_v30 = vpop.xlane.xlu1 %1439 }
 0x5a3   : > { %3743 = vrcp.f32 %v1440_v30 }
 0x5a6   : > { %v1443_v34 = vpop.xlane.xlu0 %1442 }
 0x5ad   : > { %v3744_v32 = vpop.eup %3743 }
 0x5ae   : > { %v1454_v33 = vmul.f32 %v3744_v32, %v3736_v16  ;;  %v1974_v16 = vld [vmem:[#allocation16] sm:$0xff] }
 0x5af   : > { %v1446_v35 = vpop.xlane.xlu1 %1445  ;;  %v3591_v18 = vpack.c.bf16 %v1975_v17, %v1974_v16 }
 0x5b0   : > { %3745 = vrcp.f32 %v1446_v35  ;;  %3441 = vmatmul.mubr.msk.f32.vlgmr.msra.gmra.mrb[2].mxu0 %vm1035_vm4, %v1454_v33 }
 0x5b1   : > { %3450 = vmatprep.mubr.msk.f32.mxu0 %vm4073_vm1, %v4074_v13  ;;  %3747 = vrcp.f32 %v1443_v34 }
 0x5b3   : > { %v1072_v36 = vpop.permute.xlu1 %1071  ;;  %v1449_v37 = vpop.xlane.xlu0 %1448 }
 0x5b4   : > { %1075 = vst.msk [vmem:[#allocation4 + $0x10] sm:$0xff] %vm1035_vm4, %v1072_v36  ;;  %3749 = vrcp.f32 %v1449_v37  ;;  %v3306_v37 = vld [vmem:[%s4942_s20] ss:$0 sm:$0xff] }
 0x5b7   : > { %v1087_v38 = vpop.permute.xlu1 %1086  ;;  %v1057_v31 = vpop.permute.xlu0 %1056 }
 0x5b8   : > { %1090 = vst.msk [vmem:[#allocation4 + $0x18] sm:$0xff] %vm1035_vm4, %v1087_v38  ;;  %1060 = vst.msk [vmem:[#allocation4 + $0x8] sm:$0xff] %vm1035_vm4, %v1057_v31 }
 0x5ba   : > { %v3746_v39 = vpop.eup %3745 }
 0x5bb   : > { %v1456_v40 = vmul.f32 %v3746_v39, %v3740_v26  ;;  %v1460_v41 = vld [vmem:[#allocation4 + $0x10] sm:$0xff]  ;;  %v3748_v42 = vpop.eup %3747  ;;  %v905_v26 = vld [vmem:[%s794_s15] sm:$0xff]  ;;  %s5045_s15 = smov 72  }
 0x5bc   : > { %3449 = vmatpush3.msra.mxu0 %v1460_v41  ;;  %v1455_v43 = vmul.f32 %v3748_v42, %v3738_v22  ;;  %v1891_v22 = vld [vmem:[%s5040_s10 + $0x8] sm:$0xff]  ;;  %v3307_v39 = vld [vmem:[%s4943_s21] ss:$0 sm:$0xff] }
 0x5bd   : > { %3451 = vmatmul.mubr.msk.f32.vlgmr.msra.gmra.mrb[4].mxu0 %vm1035_vm4, %v1456_v40  ;;  %3578 = vmatprep.subr.bf16.mxu0 %v4072_v10  ;;  %v3585_v24 = vpack.c.bf16 %v1891_v22, %v1890_v21  ;;  %v3310_v42 = vld [vmem:[%s4933_s11] ss:$0 sm:$0xff] }
 0x5be   : > { %3466 = vmatprep.mubr.msk.f32.mxu0 %vm4073_vm1, %v4074_v13  ;;  %v3750_v45 = vpop.eup %3749  ;;  %3580 = vmatpush3.bf16.msra.mxu0 %v3579_v52 }
 0x5bf   : > { %v1459_v44 = vld [vmem:[#allocation4 + $0x8] sm:$0xff]  ;;  %v1461_v46 = vld [vmem:[#allocation4 + $0x18] sm:$0xff]  ;;  %v1457_v47 = vmul.f32 %v3750_v45, %v3742_v28  ;;  %3581 = vmatprep.subr.bf16.mxu0 %v4072_v10 }
 0x5c0   : > { %3444 = vmatpush3.msra.mxu1 %v1459_v44 }
 0x5c1   : > { %3446 = vmatmul.mubr.msk.f32.vlgmr.msra.gmra.mrb[8].mxu1 %vm1035_vm4, %v1455_v43  ;;  %3453 = vmatprep.subr.mxu1 %v4074_v13 }
 0x5c2   : > { %3454 = vmatpush3.msra.mxu1 %v1461_v46  ;;  %3455 = vmatprep.mubr.msk.f32.mxu1 %vm4073_vm1, %v4074_v13 }
 0x5c3   : > { %3584 = vmatprep.subr.bf16.mxu1 %v4072_v10  ;;  %3583 = vmatpush3.bf16.msra.mxu0 %v3582_v55 }
 0x5c4   : > { %3590 = vmatprep.subr.bf16.mxu0 %v4072_v10 }
 0x5c5   : > { %3456 = vmatmul.mubr.msk.f32.vlgmr.msra.gmra.mrb[10].mxu1 %vm1035_vm4, %v1457_v47 }
 0x5c6   : > { %3477 = vmatprep.mubr.msk.f32.mxu1 %vm4073_vm1, %v4074_v13  ;;  %3586 = vmatpush3.bf16.msra.mxu1 %v3585_v24 }
 0x5c7   : > { %3587 = vmatprep.subr.bf16.mxu1 %v4072_v10 }
 0x5ca   : > { %3589 = vmatpush3.bf16.msra.mxu1 %v3588_v27 }
 0x5cb   : > { %3491 = vmatprep.subr.mxu1 %v4074_v13 }
 0x683   : > { %v1531_v48 = vpop.f32.mrb[2].mxu0 }
 0x684   : > { %1754 = vst.msk [vmem:[#allocation7] sm:$0xff] %vm1035_vm4, %v1531_v48  ;;  %v3442_v49 = vpop.f32.mrb[3].mxu0 }
 0x690   : > { %v1677_v56 = vpop.f32.mrb[4].mxu0 }
 0x691   : > { %1762 = vrot.lane.b32.xlu1 %v1677_v56, %s4981_s2  ;;  %v3452_v57 = vpop.f32.mrb[5].mxu0  ;;  %s5047_s2 = smov 16  }
 0x694   : > { %v1604_v58 = vpop.f32.mrb[8].mxu1 }
 0x695   : > { %1756 = vrot.lane.b32.xlu0 %v1604_v58, %s4982_s23  ;;  %v3447_v59 = vpop.f32.mrb[9].mxu1  ;;  %s5048_s23 = smov 24  }
 0x698   : > { %v1750_v60 = vpop.f32.mrb[10].mxu1 }
 0x699   : > { %1768 = vrot.lane.b32.xlu0 %v1750_v60, %s4980_s13  ;;  %v3457_v61 = vpop.f32.mrb[11].mxu1  ;;  %s903_s13 = scalar_lea.vmem [#allocation20], %s4507_s22 }
 0x69a   : > { %s3101_s5 = sshll.u32 %s903_s13, 4  ;;  %s4879_s5 = int_to_ptr.vmem [resolvable:$true] %s3101_s5 }
 0x703   : > { %v1763_v63 = vpop.permute.xlu1 %1762 }
 0x707   : > { %v1757_v62 = vpop.permute.xlu0 %1756 }
 0x708   : > { %1760 = vst.msk [vmem:[#allocation7] sm:$0xff] %vm1759_vm6, %v1757_v62 }
 0x709   : > { %1766 = vst.msk [vmem:[#allocation7] sm:$0xff] %vm1765_vm7, %v1763_v63 }
 0x70b   : > { %v1769_v1 = vpop.permute.xlu0 %1768 }
 0x70c   : > { %1772 = vst.msk [vmem:[#allocation7] sm:$0xff] %vm1771_vm8, %v1769_v1 }
 0x713   : > { %v1773_v2 = vld [vmem:[#allocation7] sm:$0xff] }
 0x714   : > { %3467 = vmatmul.mubr.msk.f32.vlgmr.msra.gmra.mrb[6].mxu0 %vm908_vm0, %v1773_v2 }
 0x715   : > { %3488 = vmatprep.mubr.msk.f32.mxu0 %vm4073_vm1, %v4074_v13  ;;  %3592 = vmatpush3.bf16.msra.mxu0 %v3591_v18 }
 0x716   : > { %3593 = vmatprep.subr.bf16.mxu0 %v4072_v10 }
 0x7e7   : > { %v1849_v4 = vpop.f32.mrb[6].mxu0 }
 0x7e8   : > { %v1850_v5 = vadd.f32 %v3304_v3, %v1849_v4  ;;  %v3468_v6 = vpop.f32.mrb[7].mxu0 }
 0x7ea   : > { %v4684_v7 = vadd.f32 %v1850_v5, %v4535_v0  ;;  %v1977_v0 = vld [vmem:[#allocation16 + $0x18] sm:$0xff] }
 0x7eb   : > { %v3594_v20 = vpack.c.bf16 %v1977_v0, %v1976_v19 }
 0x7ec   : > { %v1856_v8 = vsel %vm908_vm0, %v4684_v7, 0.0 }
 0x7ed   : > { %1857 = vadd.xlane.f32.xlu1 %v1856_v8  ;;  %3595 = vmatpush3.bf16.msra.mxu0 %v3594_v20 }
 0x7ee   : > { %3501 = vmatprep.subr.mxu0 %v4074_v13 }
 0x7f0   : > { %3489 = vmatmul.mubr.msk.f32.vlgmr.msra.gmra.mrb[8].mxu0 %vm908_vm0, %v905_v26 }
 0x7f1   : > { %3503 = vmatprep.mubr.msk.f32.mxu0 %vm4073_vm1, %v4074_v13 }
 0x87a   : > { %v1858_v9 = vpop.xlane.xlu1 %1857 }
 0x87b   : > { %v1859_v11 = vmul.f32 0.03125, %v1858_v9 }
 0x87d   : > { %v1860_v12 = vsub.f32 %v4684_v7, %v1859_v11 }
 0x87f   : > { %v1861_v14 = vmul.f32 %v1860_v12, %v1860_v12  ;;  %v1881_v38 = vmul.f32 %v3306_v37, %v1860_v12 }
 0x881   : > { %v1862_v15 = vsel %vm908_vm0, %v1861_v14, 0.0 }
 0x882   : > { %1863 = vadd.xlane.f32.xlu0 %v1862_v15 }
 0x8c3   : > { %v2054_v43 = vpop.f32.mrb[8].mxu0 }
 0x8c4   : > { %v4723_v44 = vadd.f32 %v3310_v42, %v2054_v43  ;;  %v3490_v45 = vpop.f32.mrb[9].mxu0 }
 0x8c6   : > { %2065 = vst.msk [vmem:[#allocation5] sm:$0xff] %vm1035_vm4, %v4723_v44  ;;  %2076 = vrot.lane.b32.xlu0 %v4723_v44, %s4075_s17  ;;  %2090 = vrot.lane.b32.xlu1 %v4723_v44, %s4080_s3 }
 0x8ca   : > { %2104 = vrot.lane.b32.xlu0 %v4723_v44, %s4081_s24 }
 0x8cd   : > { %v2118_v46 = vld [vmem:[#allocation5] sm:$0xff] }
 0x90f   : > { %v1864_v28 = vpop.xlane.xlu0 %1863 }
 0x910   : > { %v1865_v29 = vmul.f32 0.032258064, %v1864_v28 }
 0x912   : > { %3751 = vrsqrt.f32 %v1865_v29  ;;  %vm1868_vm9 = vcmp.eq.f32.partialorder %v1865_v29, inf  ;;  %v1871_v33 = vand.u32 2147483648, %v1865_v29  ;;  %vm1870_vm10 = vcmp.eq.f32.partialorder %v1865_v29, 0.0 }
 0x91c   : > { %v3752_v30 = vpop.eup %3751 }
 0x91d   : > { %v1867_v32 = vmul.f32 %v3752_v30, %v1865_v29 }
 0x91f   : > { %v1869_v34 = vsel %vm1868_vm9, %v1865_v29, %v1867_v32 }
 0x920   : > { %v1872_v35 = vsel %vm1870_vm10, %v1871_v33, %v1869_v34 }
 0x921   : > { %v1873_v36 = vadd.f32 1e-06, %v1872_v35 }
 0x923   : > { %3753 = vrcp.f32 %v1873_v36 }
 0x92d   : > { %v3754_v31 = vpop.eup %3753 }
 0x92e   : > { %v1882_v40 = vmul.f32 %v3754_v31, %v1881_v38 }
 0x930   : > { %v1889_v41 = vadd.f32 %v3307_v39, %v1882_v40 }
 0x932   : > { %3478 = vmatmul.mubr.msk.f32.vlgmr.msra.gmra.mrb[12].mxu1 %vm908_vm0, %v1889_v41 }
 0x933   : > { %3493 = vmatprep.mubr.msk.f32.mxu1 %vm4073_vm1, %v4074_v13  ;;  %3492 = vmatpush3.xpose.msk.msra.mxu1 %vm1035_vm4, %v2118_v46 }
 0x934   : > { %3496 = vmatprep.subr.mxu1 %v4074_v13 }
 0x938   : > { %v2077_v47 = vpop.permute.xlu0 %2076  ;;  %v2091_v48 = vpop.permute.xlu1 %2090 }
 0x939   : > { %2080 = vst.msk [vmem:[#allocation5 + $0x8] sm:$0xff] %vm1035_vm4, %v2077_v47  ;;  %2094 = vst.msk [vmem:[#allocation5 + $0x10] sm:$0xff] %vm1035_vm4, %v2091_v48 }
 0x93c   : > { %v2105_v49 = vpop.permute.xlu0 %2104 }
 0x93d   : > { %2108 = vst.msk [vmem:[#allocation5 + $0x18] sm:$0xff] %vm1035_vm4, %v2105_v49 }
 0x940   : > { %v2120_v50 = vld [vmem:[#allocation5 + $0x10] sm:$0xff]  ;;  %v2119_v55 = vld [vmem:[#allocation5 + $0x8] sm:$0xff] }
 0x941   : > { %3502 = vmatpush3.xpose.msk.msra.mxu0 %vm1035_vm4, %v2120_v50 }
 0x942   : > { %3511 = vmatprep.subr.mxu0 %v4074_v13 }
 0x944   : > { %v2121_v61 = vld [vmem:[#allocation5 + $0x18] sm:$0xff] }
 0xa05   : > { %v1970_v52 = vpop.f32.mrb[12].mxu1 }
 0xa06   : > { %v1971_v53 = vadd.f32 %v3308_v51, %v1970_v52  ;;  %v3479_v54 = vpop.f32.mrb[13].mxu1 }
 0xa08   : > { %2064 = vst.msk [vmem:[#allocation2] sm:$0xff] %vm1035_vm4, %v1971_v53  ;;  %2100 = vrot.lane.b32.xlu0 %v1971_v53, %s4081_s24  ;;  %2072 = vrot.lane.b32.xlu1 %v1971_v53, %s4075_s17  ;;  %s5041_s17 = scalar_lea.vmem [#allocation14], %s4507_s22  ;;  %s5043_s24 = smov 96  }
 0xa09   : > { %v2058_v1 = vld [vmem:[%s5041_s17] sm:$0xff]  ;;  %s5056_s17 = sld [smem:[#allocation49_spill]]  ;;  %s4089_s22 = smov [#allocation20]  }
 0xa0a   : > { %vm2430_vm11 = vcmp.eq.f32.partialorder %v2058_v1, 0.0 }
 0xa0c   : > { %2086 = vrot.lane.b32.xlu1 %v1971_v53, %s4080_s3  ;;  %s5042_s3 = smov 88  }
 0xa0f   : > { %v2114_v56 = vld [vmem:[#allocation2] sm:$0xff] }
 0xa10   : > { %3494 = vmatmul.mubr.msk.f32.vlgmr.msra.gmra.mrb[14].mxu1 %vm1035_vm4, %v2114_v56 }
 0xa11   : > { %3497 = vmatpush3.xpose.msk.msra.mxu1 %vm1035_vm4, %v2119_v55  ;;  %3498 = vmatprep.mubr.msk.f32.mxu1 %vm4073_vm1, %v4074_v13 }
 0xa12   : > { %3506 = vmatprep.subr.mxu1 %v4074_v13 }
 0xa7a   : > { %v2101_v57 = vpop.permute.xlu0 %2100  ;;  %v2073_v58 = vpop.permute.xlu1 %2072 }
 0xa7b   : > { %2103 = vst.msk [vmem:[#allocation2 + $0x18] sm:$0xff] %vm1035_vm4, %v2101_v57  ;;  %2075 = vst.msk [vmem:[#allocation2 + $0x8] sm:$0xff] %vm1035_vm4, %v2073_v58 }
 0xa7e   : > { %v2087_v59 = vpop.permute.xlu1 %2086 }
 0xa7f   : > { %2089 = vst.msk [vmem:[#allocation2 + $0x10] sm:$0xff] %vm1035_vm4, %v2087_v59 }
 0xa82   : > { %v2115_v60 = vld [vmem:[#allocation2 + $0x8] sm:$0xff]  ;;  %v2117_v63 = vld [vmem:[#allocation2 + $0x18] sm:$0xff] }
 0xa83   : > { %3499 = vmatmul.mubr.msk.f32.vlgmr.msra.gmra.mrb[16].mxu1 %vm1035_vm4, %v2115_v60 }
 0xa84   : > { %3507 = vmatpush3.xpose.msk.msra.mxu1 %vm1035_vm4, %v2121_v61  ;;  %3508 = vmatprep.mubr.msk.f32.mxu1 %vm4073_vm1, %v4074_v13 }
 0xa85   : > { %3516 = vmatprep.subr.mxu1 %v4074_v13 }
 0xa86   : > { %v2116_v62 = vld [vmem:[#allocation2 + $0x10] sm:$0xff] }
 0xa87   : > { %3504 = vmatmul.mubr.msk.f32.vlgmr.msra.gmra.mrb[10].mxu0 %vm1035_vm4, %v2116_v62  ;;  %3509 = vmatmul.mubr.msk.f32.vlgmr.msra.gmra.mrb[18].mxu1 %vm1035_vm4, %v2117_v63 }
 0xa88   : > { %3513 = vmatprep.mubr.msk.f32.mxu0 %vm4073_vm1, %v4074_v13  ;;  %3518 = vmatprep.mubr.msk.f32.mxu1 %vm4073_vm1, %v4074_v13 }
 0xae3   : > { %v2194_v2 = vpop.f32.mrb[14].mxu1 }
 0xae4   : > { %v2426_v3 = vmul.f32 0.35355338, %v2194_v2  ;;  %v3495_v4 = vpop.f32.mrb[15].mxu1 }
 0xae5   : > { %v2060_v4 = vld [vmem:[#allocation17 + $0x8] sm:$0xff] }
 0xae6   : > { %v2433_v5 = vsel %vm2430_vm11, -1e+09, %v2426_v3  ;;  %v2059_v3 = vld [vmem:[#allocation17] sm:$0xff] }
 0xae7   : > { %v2437_v6 = vsel %vm1035_vm4, %v2433_v5, -inf }
 0xae8   : > { %2438 = vmax.xlane.f32.xlu1 %v2437_v6  ;;  %v2061_v6 = vld [vmem:[#allocation17 + $0x10] sm:$0xff] }
 0xb56   : > { %v2270_v8 = vpop.f32.mrb[16].mxu1 }
 0xb57   : > { %v2427_v9 = vmul.f32 0.35355338, %v2270_v8  ;;  %v3500_v11 = vpop.f32.mrb[17].mxu1  ;;  %v2062_v8 = vld [vmem:[#allocation17 + $0x18] sm:$0xff] }
 0xb59   : > { %v2434_v12 = vsel %vm2430_vm11, -1e+09, %v2427_v9  ;;  %v3600_v9 = vpack.c.bf16 %v2062_v8, %v2061_v6 }
 0xb5a   : > { %v2346_v14 = vpop.f32.mrb[10].mxu0  ;;  %v2422_v15 = vpop.f32.mrb[18].mxu1  ;;  %v2440_v16 = vsel %vm1035_vm4, %v2434_v12, -inf }
 0xb5b   : > { %v2428_v17 = vmul.f32 0.35355338, %v2346_v14  ;;  %v2429_v18 = vmul.f32 0.35355338, %v2422_v15  ;;  %v3505_v19 = vpop.f32.mrb[11].mxu0  ;;  %2441 = vmax.xlane.f32.xlu0 %v2440_v16  ;;  %v3510_v0 = vpop.f32.mrb[19].mxu1 }
 0xb5d   : > { %v2435_v20 = vsel %vm2430_vm11, -1e+09, %v2428_v17  ;;  %v2436_v21 = vsel %vm2430_vm11, -1e+09, %v2429_v18 }
 0xb5e   : > { %v2443_v22 = vsel %vm1035_vm4, %v2435_v20, -inf  ;;  %v2446_v23 = vsel %vm1035_vm4, %v2436_v21, -inf }
 0xb5f   : > { %2444 = vmax.xlane.f32.xlu0 %v2443_v22  ;;  %2447 = vmax.xlane.f32.xlu1 %v2446_v23 }
 0xb70   : > { %2081 = vrot.lane.b32.xlu1 %v4723_v44, %s5042_s3  ;;  %s5050_s3 = sld [smem:[#allocation45_spill]] }
 0xb75   : > { %2067 = vrot.lane.b32.xlu0 %v4723_v44, %s5043_s24  ;;  %v2439_v24 = vpop.xlane.xlu1 %2438  ;;  %s5053_s24 = sld [smem:[#allocation44_spill]] }
 0xb76   : > { %v2449_v25 = vsub.f32 %v2433_v5, %v2439_v24  ;;  %v3597_v5 = vpack.c.bf16 %v2060_v4, %v2059_v3 }
 0xb78   : > { %v2453_v26 = vmul.f32 1.442695, %v2449_v25 }
 0xb7a   : > { %3755 = vpow2.f32 %v2453_v26 }
 0xb84   : > { %v3756_v27 = vpop.eup %3755 }
 0xb85   : > { %v2461_v28 = vsel %vm1035_vm4, %v3756_v27, 0.0 }
 0xb94   : > { %2462 = vadd.xlane.f32.xlu0 %v2461_v28 }
 0xbe8   : > { %v2442_v29 = vpop.xlane.xlu0 %2441 }
 0xbe9   : > { %v2450_v30 = vsub.f32 %v2434_v12, %v2442_v29 }
 0xbeb   : > { %v2455_v32 = vmul.f32 1.442695, %v2450_v30 }
 0xbec   : > { %v2445_v33 = vpop.xlane.xlu0 %2444  ;;  %v2448_v34 = vpop.xlane.xlu1 %2447 }
 0xbed   : > { %3757 = vpow2.f32 %v2455_v32  ;;  %v2451_v35 = vsub.f32 %v2435_v20, %v2445_v33  ;;  %v2452_v36 = vsub.f32 %v2436_v21, %v2448_v34  ;;  %v3324_v21 = vld [vmem:[%s5049_s4] ss:$0 sm:$0xff]  ;;  %v2910_v32 = vld [vmem:[#allocation19] sm:$0xff]  ;;  %v2911_v33 = vld [vmem:[#allocation19 + $0x8] sm:$0xff] }
 0xbee   : > { %v2912_v34 = vld [vmem:[#allocation19 + $0x10] sm:$0xff] }
 0xbef   : > { %v2457_v37 = vmul.f32 1.442695, %v2451_v35  ;;  %v2459_v38 = vmul.f32 1.442695, %v2452_v36  ;;  %v3603_v35 = vpack.c.bf16 %v2911_v33, %v2910_v32  ;;  %v2913_v36 = vld [vmem:[#allocation19 + $0x18] sm:$0xff] }
 0xbf0   : > { %v2068_v31 = vpop.permute.xlu0 %2067  ;;  %v2082_v39 = vpop.permute.xlu1 %2081 }
 0xbf1   : > { %3759 = vpow2.f32 %v2457_v37  ;;  %2070 = vst.msk [vmem:[#allocation6] sm:$0xff] %vm1035_vm4, %v2068_v31  ;;  %2085 = vst.msk [vmem:[#allocation6 + $0x8] sm:$0xff] %vm1035_vm4, %v2082_v39  ;;  %v2995_v37 = vld [vmem:[%s5050_s3] sm:$0xff]  ;;  %v2997_v31 = vld [vmem:[%s5050_s3 + $0x10] sm:$0xff] }
 0xbf2   : > { %3761 = vpow2.f32 %v2459_v38  ;;  %v2996_v38 = vld [vmem:[%s5050_s3 + $0x8] sm:$0xff] }
 0xbf3   : > { %v3609_v39 = vpack.c.bf16 %v2996_v38, %v2995_v37 }
 0xbf7   : > { %v3758_v40 = vpop.eup %3757 }
 0xbf8   : > { %v2481_v41 = vld [vmem:[#allocation6] sm:$0xff]  ;;  %v2464_v42 = vsel %vm1035_vm4, %v3758_v40, 0.0  ;;  %v2482_v43 = vld [vmem:[#allocation6 + $0x8] sm:$0xff] }
 0xbf9   : > { %3512 = vmatpush3.msra.mxu0 %v2481_v41  ;;  %2465 = vadd.xlane.f32.xlu1 %v2464_v42  ;;  %v2999_v42 = vld [vmem:[%s5050_s3 + $0x20] sm:$0xff] }
 0xbfa   : > { %3517 = vmatpush3.msra.mxu1 %v2482_v43  ;;  %3521 = vmatprep.subr.mxu0 %v4074_v13  ;;  %v3000_v43 = vld [vmem:[%s5050_s3 + $0x28] sm:$0xff] }
 0xbfb   : > { %v3760_v45 = vpop.eup %3759  ;;  %3526 = vmatprep.subr.mxu1 %v4074_v13 }
 0xbfc   : > { %v3762_v46 = vpop.eup %3761  ;;  %v2467_v47 = vsel %vm1035_vm4, %v3760_v45, 0.0 }
 0xbfd   : > { %2468 = vadd.xlane.f32.xlu0 %v2467_v47  ;;  %v2470_v48 = vsel %vm1035_vm4, %v3762_v46, 0.0 }
 0xbfe   : > { %2471 = vadd.xlane.f32.xlu1 %v2470_v48 }
 0xc0f   : > { %2095 = vrot.lane.b32.xlu1 %v4723_v44, %s5044_s7  ;;  %s5051_s7 = sld [smem:[#allocation47_spill]] }
 0xc13   : > { %2109 = vrot.lane.b32.xlu0 %v4723_v44, %s5045_s15  ;;  %s3088_s15 = scalar_lea.sflag [#allocation10], %s4504_s30 }
 0xc21   : > { %v2463_v49 = vpop.xlane.xlu0 %2462 }
 0xc22   : > { %3763 = vrcp.f32 %v2463_v49 }
 0xc2c   : > { %v3764_v50 = vpop.eup %3763 }
 0xc2d   : > { %v2477_v51 = vmul.f32 %v3764_v50, %v3756_v27 }
 0xc2f   : > { %3514 = vmatmul.mubr.msk.f32.vlgmr.msra.gmra.mrb[12].mxu0 %vm1035_vm4, %v2477_v51 }
 0xc30   : > { %3523 = vmatprep.mubr.msk.f32.mxu0 %vm4073_vm1, %v4074_v13 }
 0xc86   : > { %v2466_v52 = vpop.xlane.xlu1 %2465 }
 0xc87   : > { %3765 = vrcp.f32 %v2466_v52 }
 0xc8a   : > { %v2469_v53 = vpop.xlane.xlu0 %2468 }
 0xc8b   : > { %3767 = vrcp.f32 %v2469_v53  ;;  %v2472_v54 = vpop.xlane.xlu1 %2471 }
 0xc8c   : > { %3769 = vrcp.f32 %v2472_v54  ;;  %v3326_v54 = vld [vmem:[%s5051_s7] ss:$0 sm:$0xff]  ;;  %s5054_s7 = sld [smem:[#allocation30_spill]] }
 0xc8e   : > { %v2110_v55 = vpop.permute.xlu0 %2109 }
 0xc8f   : > { %2113 = vst.msk [vmem:[#allocation6 + $0x18] sm:$0xff] %vm1035_vm4, %v2110_v55  ;;  %v2096_v56 = vpop.permute.xlu1 %2095 }
 0xc90   : > { %2099 = vst.msk [vmem:[#allocation6 + $0x10] sm:$0xff] %vm1035_vm4, %v2096_v56 }
 0xc91   : > { %v3766_v44 = vpop.eup %3765 }
 0xc92   : > { %v2478_v57 = vmul.f32 %v3766_v44, %v3758_v40  ;;  %v2998_v40 = vld [vmem:[%s5050_s3 + $0x18] sm:$0xff]  ;;  %p5057_p11 = scmp.ne.s32.totalorder %s5054_s7, 0 }
 0xc93   : > { %v3612_v41 = vpack.c.bf16 %v2998_v40, %v2997_v31 }
 0xc94   : > { %3519 = vmatmul.mubr.msk.f32.vlgmr.msra.gmra.mrb[20].mxu1 %vm1035_vm4, %v2478_v57 }
 0xc95   : > { %v3768_v58 = vpop.eup %3767  ;;  %3528 = vmatprep.mubr.msk.f32.mxu1 %vm4073_vm1, %v4074_v13 }
 0xc96   : > { %v3770_v59 = vpop.eup %3769  ;;  %v2479_v60 = vmul.f32 %v3768_v58, %v3760_v45  ;;  %v2484_v61 = vld [vmem:[#allocation6 + $0x18] sm:$0xff]  ;;  %v3615_v45 = vpack.c.bf16 %v3000_v43, %v2999_v42  ;;  %v3001_v58 = vld [vmem:[%s5050_s3 + $0x30] sm:$0xff] }
 0xc97   : > { %v2480_v62 = vmul.f32 %v3770_v59, %v3762_v46  ;;  %v2483_v63 = vld [vmem:[#allocation6 + $0x10] sm:$0xff]  ;;  %3527 = vmatpush3.msra.mxu1 %v2484_v61  ;;  %v3002_v59 = vld [vmem:[%s5050_s3 + $0x38] sm:$0xff]  ;;  %v3328_v61 = vld [vmem:[%s5053_s24] ss:$0 sm:$0xff] }
 0xc98   : > { %3522 = vmatpush3.msra.mxu0 %v2483_v63  ;;  %3602 = vmatprep.subr.bf16.mxu1 %v4072_v10 }
 0xc99   : > { %3524 = vmatmul.mubr.msk.f32.vlgmr.msra.gmra.mrb[14].mxu0 %vm1035_vm4, %v2479_v60  ;;  %3529 = vmatmul.mubr.msk.f32.vlgmr.msra.gmra.mrb[22].mxu1 %vm1035_vm4, %v2480_v62  ;;  %v3618_v60 = vpack.c.bf16 %v3002_v59, %v3001_v58 }
 0xc9a   : > { %3596 = vmatprep.subr.bf16.mxu0 %v4072_v10  ;;  %3539 = vmatprep.mubr.msk.f32.mxu0 %vm4073_vm1, %v4074_v13 }
 0xc9b   : > { %3550 = vmatprep.mubr.msk.f32.mxu1 %vm4073_vm1, %v4074_v13  ;;  %3598 = vmatpush3.bf16.msra.mxu0 %v3597_v5 }
 0xc9c   : > { %3599 = vmatprep.subr.bf16.mxu0 %v4072_v10  ;;  %3604 = vmatpush3.bf16.msra.mxu1 %v3603_v35 }
 0xc9d   : > { %3605 = vmatprep.subr.bf16.mxu1 %v4072_v10 }
 0xc9f   : > { %3601 = vmatpush3.bf16.msra.mxu0 %v3600_v9 }
 0xca0   : > { %3608 = vmatprep.subr.bf16.mxu0 %v4072_v10 }
 0xd02   : > { %v2554_v1 = vpop.f32.mrb[12].mxu0 }
 0xd03   : > { %2777 = vst.msk [vmem:[#allocation7] sm:$0xff] %vm1035_vm4, %v2554_v1  ;;  %v3515_v2 = vpop.f32.mrb[13].mxu0 }
 0xd67   : > { %v2627_v11 = vpop.f32.mrb[20].mxu1 }
 0xd68   : > { %2779 = vrot.lane.b32.xlu1 %v2627_v11, %s5046_s8  ;;  %v3520_v12 = vpop.f32.mrb[21].mxu1  ;;  %s3983_s8 = sshll.u32 %s4089_s22, 4  ;;  %s3984_s8 = int_to_ptr.vmem [resolvable:$false] %s3983_s8 }
 0xd69   : > { %p3986_p13 = scmp.lt.s32.totalorder %s4879_s5, %s3984_s8 }
 0xd6c   : > { %v2700_v14 = vpop.f32.mrb[14].mxu0  ;;  %v2773_v15 = vpop.f32.mrb[22].mxu1 }
 0xd6d   : > { %2784 = vrot.lane.b32.xlu0 %v2700_v14, %s5047_s2  ;;  %v3525_v16 = vpop.f32.mrb[15].mxu0  ;;  %2789 = vrot.lane.b32.xlu1 %v2773_v15, %s5048_s23  ;;  %v3530_v17 = vpop.f32.mrb[23].mxu1  ;;  %s5052_s2 = sld [smem:[#allocation48_spill]]  ;;  %s3333_s23 = sshll.u32 %s4236_s6, 7 }
 0xd6e   : > { %s4877_s24 = scalar_lea.hbm %s5056_s17, %s3333_s23  ;;  %s3979_s6 = scalar_lea.vmem %s4879_s5, 128 }
 0xd6f   : > { %p3980_p7 = scmp.ne.s32.totalorder %s4879_s5, %s3979_s6 }
 0xd71   : > { %p3981_p10 = pnand %p3980_p7, %p5057_p11 }
 0xd73   : > { %p3982_p1 = pneg %p3981_p10 }
 0xdda   : > { %v2780_v18 = vpop.permute.xlu1 %2779 }
 0xddb   : > { %2782 = vst.msk [vmem:[#allocation7] sm:$0xff] %vm1759_vm6, %v2780_v18 }
 0xddf   : > { %v2785_v19 = vpop.permute.xlu0 %2784  ;;  %v2790_v0 = vpop.permute.xlu1 %2789 }
 0xde0   : > { %2787 = vst.msk [vmem:[#allocation7] sm:$0xff] %vm1765_vm7, %v2785_v19 }
 0xde1   : > { %2792 = vst.msk [vmem:[#allocation7] sm:$0xff] %vm1771_vm8, %v2790_v0 }
 0xde8   : > { %v2793_v20 = vld [vmem:[#allocation7] sm:$0xff] }
 0xde9   : > { %3540 = vmatmul.mubr.msk.f32.vlgmr.msra.gmra.mrb[16].mxu0 %vm908_vm0, %v2793_v20 }
 0xdea   : > { %3569 = vmatprep.mubr.msk.f32.mxu0 %vm4073_vm1, %v4074_v13  ;;  %3610 = vmatpush3.bf16.msra.mxu0 %v3609_v39 }
 0xdeb   : > { %3611 = vmatprep.subr.bf16.mxu0 %v4072_v10 }
 0xdee   : > { %3613 = vmatpush3.bf16.msra.mxu0 %v3612_v41 }
 0xdef   : > { %3614 = vmatprep.subr.bf16.mxu0 %v4072_v10 }
 0xdf2   : > { %3616 = vmatpush3.bf16.msra.mxu0 %v3615_v45 }
 0xdf3   : > { %3617 = vmatprep.subr.bf16.mxu0 %v4072_v10  ;;  %v3327_v10 = vld [vmem:[%s5052_s2] ss:$0 sm:$0xff]  ;;  %s5055_s2 = sld [smem:[#allocation46_spill]] }
 0xdf6   : > { %3619 = vmatpush3.bf16.msra.mxu0 %v3618_v60 }
 0xdf9   : > { %v3331_v4 = vld [vmem:[%s5055_s2] ss:$0 sm:$0xff]  ;;  %s3985_s2 = scalar_lea.vmem %s3984_s8, 256 }
 0xdfa   : > { %p3987_p9 = scmp.lt.s32.totalorder %s3985_s2, %s3979_s6 }
 0xdfc   : > { %p3988_p3 = por %p3987_p9, %p3986_p13 }
 0xdfe   : > { %p3989_p5 = pnand %p3988_p3, %p3982_p1 }
 0xebc   : > { %v2869_v22 = vpop.f32.mrb[16].mxu0 }
 0xebd   : > { %v2870_v23 = vadd.f32 %v3324_v21, %v2869_v22  ;;  %v3541_v24 = vpop.f32.mrb[17].mxu0 }
 0xebf   : > { %v4824_v25 = vadd.f32 %v2870_v23, %v4684_v7  ;;  %v3606_v7 = vpack.c.bf16 %v2913_v36, %v2912_v34 }
 0xec1   : > { %v2876_v26 = vsel %vm908_vm0, %v4824_v25, 0.0  ;;  %3607 = vmatpush3.bf16.msra.mxu1 %v3606_v7 }
 0xec2   : > { %2877 = vadd.xlane.f32.xlu0 %v2876_v26 }
 0xf4f   : > { %v2878_v27 = vpop.xlane.xlu0 %2877 }
 0xf50   : > { %v2879_v28 = vmul.f32 0.03125, %v2878_v27 }
 0xf52   : > { %v2880_v29 = vsub.f32 %v4824_v25, %v2879_v28 }
 0xf54   : > { %v2881_v30 = vmul.f32 %v2880_v29, %v2880_v29  ;;  %v2901_v55 = vmul.f32 %v3326_v54, %v2880_v29 }
 0xf56   : > { %v2882_v13 = vsel %vm908_vm0, %v2881_v30, 0.0 }
 0xf57   : > { %2883 = vadd.xlane.f32.xlu1 %v2882_v13 }
 0xfe4   : > { %v2884_v46 = vpop.xlane.xlu1 %2883 }
 0xfe5   : > { %v2885_v47 = vmul.f32 0.032258064, %v2884_v46 }
 0xfe7   : > { %3771 = vrsqrt.f32 %v2885_v47  ;;  %vm2888_vm12 = vcmp.eq.f32.partialorder %v2885_v47, inf  ;;  %v2891_v50 = vand.u32 2147483648, %v2885_v47  ;;  %vm2890_vm13 = vcmp.eq.f32.partialorder %v2885_v47, 0.0 }
 0xff1   : > { %v3772_v48 = vpop.eup %3771 }
 0xff2   : > { %v2887_v49 = vmul.f32 %v3772_v48, %v2885_v47 }
 0xff4   : > { %v2889_v51 = vsel %vm2888_vm12, %v2885_v47, %v2887_v49 }
 0xff5   : > { %v2892_v52 = vsel %vm2890_vm13, %v2891_v50, %v2889_v51 }
 0xff6   : > { %v2893_v53 = vadd.f32 1e-06, %v2892_v52 }
 0xff8   : > { %3773 = vrcp.f32 %v2893_v53 }
0x1002   : > { %v3774_v56 = vpop.eup %3773 }
0x1003   : > { %v2902_v44 = vmul.f32 %v3774_v56, %v2901_v55 }
0x1005   : > { %v2909_v57 = vadd.f32 %v3327_v10, %v2902_v44 }
0x1007   : > { %3551 = vmatmul.mubr.msk.f32.vlgmr.msra.gmra.mrb[24].mxu1 %vm908_vm0, %v2909_v57 }
0x10da   : > { %v2990_v62 = vpop.f32.mrb[24].mxu1 }
0x10db   : > { %v2991_v63 = vadd.f32 %v3328_v61, %v2990_v62  ;;  %v3552_v1 = vpop.f32.mrb[25].mxu1 }
0x10dd   : > { %v2994_v2 = vmax.f32 %v2991_v63, 0.0 }
0x10df   : > { %3570 = vmatmul.mubr.msk.f32.vlgmr.msra.gmra.mrb[18].mxu0 %vm3003_vm14, %v2994_v2 }
0x11b2   : > { %v3073_v3 = vpop.f32.mrb[18].mxu0 }
0x11b3   : > { %v3077_v5 = vadd.f32 %v3073_v3, %v4824_v25  ;;  %v3571_v6 = vpop.f32.mrb[19].mxu0 }
0x11b5   : > { %v3085_v8 = vadd.f32 %v3331_v4, %v3077_v5 }
0x11b7   : > { %3086 = vst.msk [vmem:[%s903_s13] sm:$0xff] %vm908_vm0, %v3085_v8 }
0x11b8   : > { %3992 = shalt.err (!%p3989_p5)
}
0x11b9   : > { %s3993_s30 = scalar_lea.hbm %s4877_s24, 128  ;;  %s3997_s4 = scalar_lea.hbm %s5056_s17, 256 }
0x11ba   : > { %p3994_p6 = scmp.ne.s32.totalorder %s4877_s24, %s3993_s30  ;;  %p3998_p4 = scmp.lt.u32.totalorder %s4877_s24, %s5056_s17 }
0x11bb   : > { %p3999_p0 = scmp.lt.u32.totalorder %s3997_s4, %s3993_s30  ;;  %p4001_p7 = scmp.lt.u32.totalorder %s3993_s30, %s4877_s24 }
0x11bc   : > { %p3995_p2 = pnand %p3994_p6, %p5057_p11 }
0x11bd   : > { %p4000_p8 = por %p3999_p0, %p3998_p4 }
0x11be   : > { %p3996_p12 = pneg %p3995_p2 }
0x11bf   : > { %p4002_p10 = por %p4001_p7, %p4000_p8 }
0x11c1   : > { %p4003_p1 = pnand %p4002_p10, %p3996_p12 }
0x11c3   : > { %4006 = shalt.err (!%p4003_p1)
}
0x11c4   : > { %3640 = dma.vmem_to_hbm [thread:$0]  (%p5057_p11), %s4879_s5, 128, %s4877_s24, %s3088_s15  }
0x11c5 PF: > { %s5058_s6 = sld [smem:[#allocation27_spill]]  ;;  %s5059_s8 = sld [smem:[#allocation28_spill]] }
0x11c6   : > { %p5061_p9 = scmp.ge.s32.totalorder %s4061_s28, 2 }
0x11cb   : > { %s3113_s2 = sand.u32 1, %s5058_s6   ;;  %p5060_p13 = scmp.ne.s32.totalorder %s5059_s8, 0 }
0x11cc   : > { %s3114_s23 = scalar_lea.sflag [#allocation10], %s3113_s2 }
0x11cd   : > { %p3666_p3 = pnand %p5061_p9, %p5060_p13 }
0x11cf   : > { %4044 = dma.done.wait (!%p3666_p3), %s3114_s23, 128  }
0x11d0   : > { %4046 = vsyncadd (!%p3666_p3), %s3114_s23, 4294967168  ;;  %s5062_s28 = sld [smem:[#allocation29_spill]]  ;;  %s5063_s30 = sld [smem:[#allocation31_spill]] }
0x11d1   : > { %s5064_s5 = smov %s4053_s26  ;;  %s5065_s26 = smov %s4057_s27 }
0x11d6   : > { %p44_p5 = scmp.ge.s32.totalorder %s5062_s28, 4   ;;  %s5066_s27 = smov %s5063_s30 }
0x11d8   :  { %46 = sbr.rel (!%p44_p5) target bundleno = 29 (0x1d), region = 225 }
0x11df   :  { %3119 = vsyncpa [#allocation9], 1 }
0x11e0   :  { %3121 = vsyncpa [#allocation9 + $0x1], 1 }
0x11e1   :  { %3122 = vsyncpa [#allocation12], 1 }
0x11e2   :  { %3124 = vsyncpa [#allocation12 + $0x1], 1 }
0x11e3   :  { %3125 = vsyncpa [#allocation15], 1 }
0x11e4   :  { %3127 = vsyncpa [#allocation15 + $0x1], 1 }
0x11e5   :  { %3128 = vsyncpa [#allocation18], 1 }
0x11e6   :  { %3129 = vsyncpa [#allocation10], 1 }
0x11e7   :  { %3131 = vsyncpa [#allocation10 + $0x1], 1 }

</bundles_post_ra>
